<compile_context>
chip_gen: v7x
topology: tpu7x:2x2x1
jax: 0.10.0
libtpu: 0.0.40
codegen_flags: <defaults>
</compile_context>

<pallas_src>
import functools

import jax
import jax.numpy as jnp
from jax.experimental import pallas as pl
from jax.experimental.pallas import tpu as pltpu

C_PAD = 128          # lane-dense padded class dimension for internal compute
NEG_BIG = -1e30      # bias for padding columns -> exp() underflows to exactly 0


def _linear_softmax_kernel(x_ref, w_ref, b_ref, o_ref, *, num_classes):
    x = x_ref[...]                       # (TB, D)      f32
    w = w_ref[...]                       # (D, C_PAD)   f32, padded cols are 0
    b = b_ref[...]                       # (1, C_PAD)   f32, padded cols NEG_BIG
    logits = jnp.dot(x, w, preferred_element_type=jnp.float32) + b
    # Row-max stabilization: mathematically identical to the module's
    # exp(m) / sum(exp(m), dim=1); padded columns (bias = -1e30) still map to
    # exactly 0 after exp and do not contribute to the denominator.
    m = jnp.max(logits, axis=1, keepdims=True)
    e = jnp.exp(logits - m)
    denom = jnp.sum(e, axis=1, keepdims=True)
    # reciprocal + multiply instead of a per-element divide; approx=False keeps
    # bit-level parity with the pure-JAX reference at 1e-5 tolerance.
    probs = e * pl.reciprocal(denom)
    # Store only the real classes; lane padding never leaves VMEM.
    o_ref[...] = probs[:, :num_classes]


def prepare_params(weight, bias, c_pad=C_PAD):
    """Hoisted per-checkpoint prep: transpose (C, D) -> (D, C) and pad C -> c_pad.

    Padded weight columns are 0 and padded bias lanes are NEG_BIG; the kernel's
    softmax correctness relies on this coupling (padded lanes exp() to 0).
    """
    c, d = weight.shape
    assert c <= c_pad, f"num_classes={c} exceeds lane padding {c_pad}"
    w_padded = jnp.zeros((d, c_pad), jnp.float32).at[:, :c].set(
        weight.T.astype(jnp.float32))
    b_padded = jnp.full((1, c_pad), NEG_BIG, jnp.float32).at[0, :c].set(
        bias.astype(jnp.float32))
    return w_padded, b_padded


def _round_up(n, m):
    return ((n + m - 1) // m) * m


@functools.partial(jax.jit, static_argnames=("num_classes",))
def torch_model_forward(x, w_padded, b_padded, *, num_classes=5):
    """Inference path of TorchModel.forward (y=None): softmax(linear(x)).

    x:        (B, D) float32
    w_padded: (D, C_PAD) float32  -- from prepare_params (weight.T, zero-padded)
    b_padded: (1, C_PAD) float32  -- from prepare_params (bias, -1e30-padded)
    returns   (B, num_classes) float32 class probabilities
    """
    b_rows, d = x.shape
    c_pad = w_padded.shape[1]

    # Guard only: align B to the 8-row sublane granule (<= 7 padded rows).
    # No padding to a multiple of the batch tile; ragged last block is masked.
    b_al = _round_up(max(b_rows, 1), 8)
    if b_al != b_rows:
        x = jnp.pad(x, ((0, b_al - b_rows), (0, 0)))

    # Big batch tiles amortize the ~0.35us per-grid-step overhead, but keep
    # >= 2 grid steps so the "parallel" axis shards across v7x's two
    # TensorCores (no effect on single-TC v5e/v6e). Double-buffered footprint
    # at tb=4096 is ~1.3 MiB of tiles + 66 KiB of resident params.
    tb = min(4096, max(8, _round_up(pl.cdiv(b_al, 2), 8)))
    grid = (pl.cdiv(b_al, tb),)

    cost = pl.CostEstimate(
        flops=2 * b_al * d * c_pad,
        transcendentals=b_al * c_pad,
        bytes_accessed=4 * (b_al * d + d * c_pad + c_pad + b_al * num_classes),
    )

    probs = pl.pallas_call(
        functools.partial(_linear_softmax_kernel, num_classes=num_classes),
        out_shape=jax.ShapeDtypeStruct((b_al, num_classes), jnp.float32),
        grid=grid,
        in_specs=[
            pl.BlockSpec((tb, d), lambda i: (i, 0)),
            # Constant index_map -> weights/bias fetched once, VMEM-resident.
            pl.BlockSpec((d, c_pad), lambda i: (0, 0)),
            pl.BlockSpec((1, c_pad), lambda i: (0, 0)),
        ],
        # Last dim == full array dim (num_classes), so the narrow block is
        # legal; the masked store is cheap relative to the saved HBM traffic.
        out_specs=pl.BlockSpec((tb, num_classes), lambda i: (i, 0)),
        compiler_params=pltpu.CompilerParams(
            dimension_semantics=("parallel",),
            vmem_limit_bytes=32 * 1024 * 1024,
        ),
        cost_estimate=cost,
    )(x, w_padded, b_padded)

    if b_al != b_rows:
        probs = probs[:b_rows]
    return probs


if __name__ == "__main__":
    key = jax.random.PRNGKey(0)
    k_x, k_w, k_b, k_x2 = jax.random.split(key, 4)

    input_size = 32
    num_classes = 5       # nn.Linear(input_size, 5)

    # Deterministic synthetic parameters (no checkpoint load).
    weight = jax.random.normal(k_w, (num_classes, input_size), jnp.float32) * 0.1
    bias = jax.random.normal(k_b, (num_classes,), jnp.float32) * 0.1
    w_p, b_p = prepare_params(weight, bias)   # hoisted: once per checkpoint

    def reference(xv):
        y_pred = xv @ weight.T + bias
        return jnp.exp(y_pred) / jnp.sum(jnp.exp(y_pred), axis=1, keepdims=True)

    # Batched path: 2 grid steps of 512 rows each (keeps both v7x TCs busy).
    batch = 1024
    x = jax.random.normal(k_x, (batch, input_size), jnp.float32)
    probs = jax.block_until_ready(
        torch_model_forward(x, w_p, b_p, num_classes=num_classes))
    assert probs.shape == (batch, num_classes)
    assert jnp.allclose(probs, reference(x), atol=1e-5, rtol=1e-5)

    # Small / ragged batch path (only a <=7-row alignment pad, sliced back).
    x_small = jax.random.normal(k_x2, (3, input_size), jnp.float32)
    probs_small = jax.block_until_ready(
        torch_model_forward(x_small, w_p, b_p, num_classes=num_classes))
    assert probs_small.shape == (3, num_classes)
    assert jnp.allclose(probs_small, reference(x_small), atol=1e-5, rtol=1e-5)

    # TODO(synk): CrossEntropyLoss training branch (y is not None) is not part
    # of the inference hot path and is left out of the kernel.
    print("KERNEL_OK")
</pallas_src>

<mosaic_0001>
module attributes {stable_mosaic.version = 11 : i64} {
  func.func @_linear_softmax_kernel(%arg0: i32, %arg1: memref<512x32xf32, #tpu.memory_space<vmem>>, %arg2: memref<32x128xf32, #tpu.memory_space<vmem>>, %arg3: memref<1x128xf32, #tpu.memory_space<vmem>>, %arg4: memref<512x5xf32, #tpu.memory_space<vmem>>) attributes {dimension_semantics = [#tpu.dimension_semantics<parallel>], iteration_bounds = array<i64: 2>, scalar_prefetch = 0 : i64, scratch_operands = 0 : i64, tpu.core_type = #tpu.core_type<tc>, window_params = [{transform_indices = @transform_0, window_bounds = array<i64: 512, 32>}, {pipeline_mode = #tpu.pipeline_mode<synchronous>, transform_indices = @transform_1, window_bounds = array<i64: 32, 128>}, {pipeline_mode = #tpu.pipeline_mode<synchronous>, transform_indices = @transform_2, window_bounds = array<i64: 1, 128>}, {transform_indices = @transform_3, window_bounds = array<i64: 512, 5>}]} {
    %c0 = arith.constant 0 : index
    %c0_0 = arith.constant 0 : index
    %0 = vector.load %arg1[%c0, %c0_0] : memref<512x32xf32, #tpu.memory_space<vmem>>, vector<512x32xf32>
    %c0_1 = arith.constant 0 : index
    %c0_2 = arith.constant 0 : index
    %1 = vector.load %arg2[%c0_1, %c0_2] : memref<32x128xf32, #tpu.memory_space<vmem>>, vector<32x128xf32>
    %c0_3 = arith.constant 0 : index
    %c0_4 = arith.constant 0 : index
    %2 = vector.load %arg3[%c0_3, %c0_4] : memref<1x128xf32, #tpu.memory_space<vmem>>, vector<1x128xf32>
    %cst = arith.constant dense<0.000000e+00> : vector<512x128xf32>
    %3 = tpu.matmul %0, %1, %cst {dimension_numbers = #tpu.dot_dimension_numbers<[1], [0], [0], [1], [0, 0, 1, 1], [], []>} : vector<512x32xf32>, vector<32x128xf32>, vector<512x128xf32> -> vector<512x128xf32>
    %4 = vector.broadcast %2 : vector<1x128xf32> to vector<512x128xf32>
    %5 = arith.addf %3, %4 : vector<512x128xf32>
    %cst_5 = arith.constant dense<0xFF800000> : vector<512xf32>
    %6 = vector.multi_reduction <maximumf>, %5, %cst_5 [1] : vector<512x128xf32> to vector<512xf32>
    %7 = vector.shape_cast %6 : vector<512xf32> to vector<512x1xf32>
    %8 = vector.broadcast %7 : vector<512x1xf32> to vector<512x128xf32>
    %9 = arith.subf %5, %8 : vector<512x128xf32>
    %10 = math.exp %9 : vector<512x128xf32>
    %cst_6 = arith.constant dense<0.000000e+00> : vector<512xf32>
    %11 = vector.multi_reduction <add>, %10, %cst_6 [1] : vector<512x128xf32> to vector<512xf32>
    %12 = vector.shape_cast %11 : vector<512xf32> to vector<512x1xf32>
    %13 = tpu.reciprocal %12 : vector<512x1xf32> -> vector<512x1xf32>
    %14 = vector.broadcast %13 : vector<512x1xf32> to vector<512x128xf32>
    %15 = arith.mulf %10, %14 : vector<512x128xf32>
    %16 = vector.extract_strided_slice %15 {offsets = [0, 0], sizes = [512, 5], strides = [1, 1]} : vector<512x128xf32> to vector<512x5xf32>
    %c0_7 = arith.constant 0 : index
    %c0_8 = arith.constant 0 : index
    %17 = vector.load %arg4[%c0_7, %c0_8] : memref<512x5xf32, #tpu.memory_space<vmem>>, vector<512x5xf32>
    tpu.vector_store %arg4[%c0_7, %c0_8], %16 {strides = array<i32>} : memref<512x5xf32, #tpu.memory_space<vmem>>, vector<512x5xf32>,
    return
  }
  func.func @transform_0(%arg0: i32) -> (i32, i32) {
    %c0_i32 = arith.constant 0 : i32
    %c0_i32_0 = arith.constant 0 : i32
    return %arg0, %c0_i32 : i32, i32
  }
  func.func @transform_1(%arg0: i32) -> (i32, i32) {
    %c0_i32 = arith.constant 0 : i32
    %c0_i32_0 = arith.constant 0 : i32
    %c0_i32_1 = arith.constant 0 : i32
    return %c0_i32, %c0_i32_0 : i32, i32
  }
  func.func @transform_2(%arg0: i32) -> (i32, i32) {
    %c0_i32 = arith.constant 0 : i32
    %c0_i32_0 = arith.constant 0 : i32
    %c0_i32_1 = arith.constant 0 : i32
    return %c0_i32, %c0_i32_0 : i32, i32
  }
  func.func @transform_3(%arg0: i32) -> (i32, i32) {
    %c0_i32 = arith.constant 0 : i32
    %c0_i32_0 = arith.constant 0 : i32
    return %arg0, %c0_i32 : i32, i32
  }
}

</mosaic_0001>

<bundles_post_ra>
// kernel: torch_model_forward.1
= control target key start
LH: loop header
LB: loop body
LE: loop exit
PB: predicated region body
PF: predicated region fallthrough
CT: control target
= control target key end

     0   :  { %s2076_s12 = smov 0   ;;  %s2971_s0 = inlined_call_operand.vmem [shape: f32[1024,32], index: 0, kind: input, shape index: {}]   ;;  %s2972_s1 = inlined_call_operand.vmem [shape: f32[32,128], index: 1, kind: input, shape index: {}]   ;;  %s2973_s2 = inlined_call_operand.vmem [shape: f32[1,128], index: 2, kind: input, shape index: {}]   ;;  %s2974_s3 = inlined_call_operand.vmem [shape: f32[1024,5], index: 3, kind: output, shape index: {}]  }
   0x1 LB: > { %s1524_s13 = sadd.s32 4294967295, %s2054_s12   ;;  %p1528_p0 = scmp.ge.s32.totalorder %s2054_s12, 1  ;;  %s2054_s12 = sphi %s2076_s12, %s13_s12  }
   0x2   : > { %p138_p1 = scmp.lt.s32.totalorder %s2054_s12, 3 }
   0x4   : > { %p139_p2 = pnand %p1528_p0, %p138_p1 }
   0x6   : > { %142 = sbr.rel (%p139_p2) target bundleno = 681 (0x2a9), region = 32 }
   0xd   : > { %v238_v0 = vld [vmem:[%s2972_s1] sm:$0xff]  ;;  %v239_v1 = vld [vmem:[%s2972_s1 + $0x8] sm:$0xff]  ;;  %v240_v2 = vld [vmem:[%s2972_s1 + $0x10] sm:$0xff]  ;;  %s1529_s20 = sshll.u32 %s1524_s13, 6  ;;  %vm249_vm0 = vcmask 261120   ;;  %vm1403_vm1 = vcmask 39936  }
   0xe   : > { %v1772_v3 = vpack.c.bf16 %v239_v1, %v238_v0  ;;  %v241_v4 = vld [vmem:[%s2972_s1 + $0x18] sm:$0xff]  ;;  %p163_p3 = scmp.lt.s32.totalorder %s1529_s20, 127 }
   0xf   : > { %v1776_v5 = vpack.c.bf16 %v241_v4, %v240_v2 }
  0x10   : > { %1773 = vmatprep.subr.bf16.mxu0 %v1772_v3  ;;  %1780 = vmatprep.subr.bf16.mxu1 %v1772_v3  ;;  %s3051_s20 = smov (!%p163_p3, %s1529_s20), 127 }
  0x11   : > { %1775 = vmatpush3.bf16.msra.mxu0 %v1772_v3  ;;  %1782 = vmatpush3.bf16.msra.mxu1 %v1772_v3  ;;  %s1530_s23 = sshll.u32 %s3051_s20, 3 }
  0x12   : > { %1777 = vmatprep.subr.bf16.mxu0 %v1776_v5  ;;  %1781 = vmatprep.subr.bf16.mxu1 %v1776_v5  ;;  %s2104_s26 = scalar_lea.vmem %s2971_s0, %s1530_s23  ;;  %s2774_s4 = scalar_lea.vmem %s2974_s3, %s1530_s23 }
  0x13   : > { %v174_v6 = vld [vmem:[%s2104_s26] sm:$0xff]  ;;  %v175_v8 = vld [vmem:[%s2104_s26 + $0x8] sm:$0xff]  ;;  %v176_v10 = vld [vmem:[%s2104_s26 + $0x10] sm:$0xff] }
  0x14   : > { %v206_v7 = vld [vmem:[%s2104_s26 + $0x100] sm:$0xff]  ;;  %v207_v9 = vld [vmem:[%s2104_s26 + $0x108] sm:$0xff]  ;;  %1676 = vmatprep.mubr.msk.f32.mxu0 %vm249_vm0, %v174_v6  ;;  %v208_v11 = vld [vmem:[%s2104_s26 + $0x110] sm:$0xff] }
  0x15   : > { %1779 = vmatpush3.bf16.msra.mxu0 %v1776_v5  ;;  %1783 = vmatpush3.bf16.msra.mxu1 %v1776_v5  ;;  %v177_v12 = vld [vmem:[%s2104_s26 + $0x18] sm:$0xff]  ;;  %v178_v14 = vld [vmem:[%s2104_s26 + $0x20] sm:$0xff]  ;;  %v179_v16 = vld [vmem:[%s2104_s26 + $0x28] sm:$0xff] }
  0x16   : > { %1724 = vmatprep.mubr.msk.f32.mxu1 %vm249_vm0, %v206_v7  ;;  %v209_v13 = vld [vmem:[%s2104_s26 + $0x118] sm:$0xff]  ;;  %v210_v15 = vld [vmem:[%s2104_s26 + $0x120] sm:$0xff]  ;;  %v211_v17 = vld [vmem:[%s2104_s26 + $0x128] sm:$0xff] }
  0x17   : > { %v180_v18 = vld [vmem:[%s2104_s26 + $0x30] sm:$0xff]  ;;  %v181_v20 = vld [vmem:[%s2104_s26 + $0x38] sm:$0xff]  ;;  %v182_v22 = vld [vmem:[%s2104_s26 + $0x40] sm:$0xff] }
  0x18   : > { %1677 = vmatmul.mubr.msk.f32.vlgmr.msra.gmra.mrb[0].mxu0 %vm249_vm0, %v175_v8  ;;  %1725 = vmatmul.mubr.msk.f32.vlgmr.msra.gmra.mrb[0].mxu1 %vm249_vm0, %v207_v9  ;;  %v212_v19 = vld [vmem:[%s2104_s26 + $0x130] sm:$0xff]  ;;  %v213_v21 = vld [vmem:[%s2104_s26 + $0x138] sm:$0xff]  ;;  %v214_v23 = vld [vmem:[%s2104_s26 + $0x140] sm:$0xff] }
  0x19   : > { %1679 = vmatprep.mubr.msk.f32.mxu0 %vm249_vm0, %v176_v10  ;;  %1727 = vmatprep.mubr.msk.f32.mxu1 %vm249_vm0, %v208_v11  ;;  %v183_v24 = vld [vmem:[%s2104_s26 + $0x48] sm:$0xff]  ;;  %v184_v26 = vld [vmem:[%s2104_s26 + $0x50] sm:$0xff]  ;;  %v185_v28 = vld [vmem:[%s2104_s26 + $0x58] sm:$0xff] }
  0x1a   : > { %v215_v25 = vld [vmem:[%s2104_s26 + $0x148] sm:$0xff]  ;;  %v216_v27 = vld [vmem:[%s2104_s26 + $0x150] sm:$0xff]  ;;  %v217_v29 = vld [vmem:[%s2104_s26 + $0x158] sm:$0xff] }
  0x1b   : > { %v186_v30 = vld [vmem:[%s2104_s26 + $0x60] sm:$0xff]  ;;  %v187_v32 = vld [vmem:[%s2104_s26 + $0x68] sm:$0xff]  ;;  %v188_v34 = vld [vmem:[%s2104_s26 + $0x70] sm:$0xff] }
  0x1c   : > { %1680 = vmatmul.mubr.msk.f32.gmra.mrb[2].mxu0 %vm249_vm0, %v177_v12  ;;  %1728 = vmatmul.mubr.msk.f32.gmra.mrb[2].mxu1 %vm249_vm0, %v209_v13  ;;  %v218_v31 = vld [vmem:[%s2104_s26 + $0x160] sm:$0xff]  ;;  %v219_v33 = vld [vmem:[%s2104_s26 + $0x168] sm:$0xff]  ;;  %v220_v35 = vld [vmem:[%s2104_s26 + $0x170] sm:$0xff] }
  0x1d   : > { %1682 = vmatprep.mubr.msk.f32.mxu0 %vm249_vm0, %v178_v14  ;;  %1730 = vmatprep.mubr.msk.f32.mxu1 %vm249_vm0, %v210_v15  ;;  %v189_v36 = vld [vmem:[%s2104_s26 + $0x78] sm:$0xff]  ;;  %v190_v38 = vld [vmem:[%s2104_s26 + $0x80] sm:$0xff]  ;;  %v191_v40 = vld [vmem:[%s2104_s26 + $0x88] sm:$0xff] }
  0x1e   : > { %v221_v37 = vld [vmem:[%s2104_s26 + $0x178] sm:$0xff]  ;;  %v222_v39 = vld [vmem:[%s2104_s26 + $0x180] sm:$0xff]  ;;  %v223_v41 = vld [vmem:[%s2104_s26 + $0x188] sm:$0xff] }
  0x1f   : > { %v192_v42 = vld [vmem:[%s2104_s26 + $0x90] sm:$0xff]  ;;  %v193_v44 = vld [vmem:[%s2104_s26 + $0x98] sm:$0xff]  ;;  %v194_v46 = vld [vmem:[%s2104_s26 + $0xa0] sm:$0xff] }
  0x20   : > { %1683 = vmatmul.mubr.msk.f32.gmra.mrb[4].mxu0 %vm249_vm0, %v179_v16  ;;  %1731 = vmatmul.mubr.msk.f32.gmra.mrb[4].mxu1 %vm249_vm0, %v211_v17  ;;  %v224_v43 = vld [vmem:[%s2104_s26 + $0x190] sm:$0xff]  ;;  %v225_v45 = vld [vmem:[%s2104_s26 + $0x198] sm:$0xff]  ;;  %v226_v47 = vld [vmem:[%s2104_s26 + $0x1a0] sm:$0xff] }
  0x21   : > { %1685 = vmatprep.mubr.msk.f32.mxu0 %vm249_vm0, %v180_v18  ;;  %1733 = vmatprep.mubr.msk.f32.mxu1 %vm249_vm0, %v212_v19  ;;  %v195_v48 = vld [vmem:[%s2104_s26 + $0xa8] sm:$0xff]  ;;  %v196_v50 = vld [vmem:[%s2104_s26 + $0xb0] sm:$0xff]  ;;  %v197_v52 = vld [vmem:[%s2104_s26 + $0xb8] sm:$0xff] }
  0x22   : > { %v227_v49 = vld [vmem:[%s2104_s26 + $0x1a8] sm:$0xff]  ;;  %v228_v51 = vld [vmem:[%s2104_s26 + $0x1b0] sm:$0xff]  ;;  %v229_v53 = vld [vmem:[%s2104_s26 + $0x1b8] sm:$0xff] }
  0x23   : > { %v198_v54 = vld [vmem:[%s2104_s26 + $0xc0] sm:$0xff]  ;;  %v199_v56 = vld [vmem:[%s2104_s26 + $0xc8] sm:$0xff]  ;;  %v200_v58 = vld [vmem:[%s2104_s26 + $0xd0] sm:$0xff] }
  0x24   : > { %1686 = vmatmul.mubr.msk.f32.gmra.mrb[6].mxu0 %vm249_vm0, %v181_v20  ;;  %1734 = vmatmul.mubr.msk.f32.gmra.mrb[6].mxu1 %vm249_vm0, %v213_v21  ;;  %v230_v55 = vld [vmem:[%s2104_s26 + $0x1c0] sm:$0xff]  ;;  %v231_v57 = vld [vmem:[%s2104_s26 + $0x1c8] sm:$0xff]  ;;  %v232_v59 = vld [vmem:[%s2104_s26 + $0x1d0] sm:$0xff] }
  0x25   : > { %1688 = vmatprep.mubr.msk.f32.mxu0 %vm249_vm0, %v182_v22  ;;  %1736 = vmatprep.mubr.msk.f32.mxu1 %vm249_vm0, %v214_v23  ;;  %v201_v60 = vld [vmem:[%s2104_s26 + $0xd8] sm:$0xff]  ;;  %v202_v62 = vld [vmem:[%s2104_s26 + $0xe0] sm:$0xff]  ;;  %v203_v0 = vld [vmem:[%s2104_s26 + $0xe8] sm:$0xff] }
  0x26   : > { %v233_v61 = vld [vmem:[%s2104_s26 + $0x1d8] sm:$0xff]  ;;  %v234_v63 = vld [vmem:[%s2104_s26 + $0x1e0] sm:$0xff]  ;;  %v235_v1 = vld [vmem:[%s2104_s26 + $0x1e8] sm:$0xff] }
  0x27   : > { %v204_v2 = vld [vmem:[%s2104_s26 + $0xf0] sm:$0xff]  ;;  %v205_v4 = vld [vmem:[%s2104_s26 + $0xf8] sm:$0xff]  ;;  %v2237_v6 = vld [vmem:[%s2973_s2] ss:$0 sm:$0xff] }
  0x28   : > { %1689 = vmatmul.mubr.msk.f32.gmra.mrb[8].mxu0 %vm249_vm0, %v183_v24  ;;  %1737 = vmatmul.mubr.msk.f32.gmra.mrb[8].mxu1 %vm249_vm0, %v215_v25  ;;  %v236_v3 = vld [vmem:[%s2104_s26 + $0x1f0] sm:$0xff]  ;;  %v237_v5 = vld [vmem:[%s2104_s26 + $0x1f8] sm:$0xff] }
  0x29   : > { %1691 = vmatprep.mubr.msk.f32.mxu0 %vm249_vm0, %v184_v26  ;;  %1739 = vmatprep.mubr.msk.f32.mxu1 %vm249_vm0, %v216_v27 }
  0x2c   : > { %1692 = vmatmul.mubr.msk.f32.gmra.mrb[10].mxu0 %vm249_vm0, %v185_v28  ;;  %1740 = vmatmul.mubr.msk.f32.gmra.mrb[10].mxu1 %vm249_vm0, %v217_v29 }
  0x2d   : > { %1694 = vmatprep.mubr.msk.f32.mxu0 %vm249_vm0, %v186_v30  ;;  %1742 = vmatprep.mubr.msk.f32.mxu1 %vm249_vm0, %v218_v31 }
  0x30   : > { %1695 = vmatmul.mubr.msk.f32.gmra.mrb[12].mxu0 %vm249_vm0, %v187_v32  ;;  %1743 = vmatmul.mubr.msk.f32.gmra.mrb[12].mxu1 %vm249_vm0, %v219_v33 }
  0x31   : > { %1697 = vmatprep.mubr.msk.f32.mxu0 %vm249_vm0, %v188_v34  ;;  %1745 = vmatprep.mubr.msk.f32.mxu1 %vm249_vm0, %v220_v35 }
  0x34   : > { %1698 = vmatmul.mubr.msk.f32.gmra.mrb[14].mxu0 %vm249_vm0, %v189_v36  ;;  %1746 = vmatmul.mubr.msk.f32.gmra.mrb[14].mxu1 %vm249_vm0, %v221_v37 }
  0x35   : > { %1700 = vmatprep.mubr.msk.f32.mxu0 %vm249_vm0, %v190_v38  ;;  %1748 = vmatprep.mubr.msk.f32.mxu1 %vm249_vm0, %v222_v39 }
  0x38   : > { %1701 = vmatmul.mubr.msk.f32.gmra.mrb[16].mxu0 %vm249_vm0, %v191_v40  ;;  %1749 = vmatmul.mubr.msk.f32.gmra.mrb[16].mxu1 %vm249_vm0, %v223_v41 }
  0x39   : > { %1703 = vmatprep.mubr.msk.f32.mxu0 %vm249_vm0, %v192_v42  ;;  %1751 = vmatprep.mubr.msk.f32.mxu1 %vm249_vm0, %v224_v43 }
  0x3c   : > { %1704 = vmatmul.mubr.msk.f32.gmra.mrb[18].mxu0 %vm249_vm0, %v193_v44  ;;  %1752 = vmatmul.mubr.msk.f32.gmra.mrb[18].mxu1 %vm249_vm0, %v225_v45 }
  0x3d   : > { %1706 = vmatprep.mubr.msk.f32.mxu0 %vm249_vm0, %v194_v46  ;;  %1754 = vmatprep.mubr.msk.f32.mxu1 %vm249_vm0, %v226_v47 }
  0x40   : > { %1707 = vmatmul.mubr.msk.f32.gmra.mrb[20].mxu0 %vm249_vm0, %v195_v48  ;;  %1755 = vmatmul.mubr.msk.f32.gmra.mrb[20].mxu1 %vm249_vm0, %v227_v49 }
  0x41   : > { %1709 = vmatprep.mubr.msk.f32.mxu0 %vm249_vm0, %v196_v50  ;;  %1757 = vmatprep.mubr.msk.f32.mxu1 %vm249_vm0, %v228_v51 }
  0x44   : > { %1710 = vmatmul.mubr.msk.f32.gmra.mrb[22].mxu0 %vm249_vm0, %v197_v52  ;;  %1758 = vmatmul.mubr.msk.f32.gmra.mrb[22].mxu1 %vm249_vm0, %v229_v53 }
  0x45   : > { %1712 = vmatprep.mubr.msk.f32.mxu0 %vm249_vm0, %v198_v54  ;;  %1760 = vmatprep.mubr.msk.f32.mxu1 %vm249_vm0, %v230_v55 }
  0x48   : > { %1713 = vmatmul.mubr.msk.f32.gmra.mrb[24].mxu0 %vm249_vm0, %v199_v56  ;;  %1761 = vmatmul.mubr.msk.f32.gmra.mrb[24].mxu1 %vm249_vm0, %v231_v57 }
  0x49   : > { %1715 = vmatprep.mubr.msk.f32.mxu0 %vm249_vm0, %v200_v58  ;;  %1763 = vmatprep.mubr.msk.f32.mxu1 %vm249_vm0, %v232_v59 }
  0x4c   : > { %1716 = vmatmul.mubr.msk.f32.gmra.mrb[26].mxu0 %vm249_vm0, %v201_v60  ;;  %1764 = vmatmul.mubr.msk.f32.gmra.mrb[26].mxu1 %vm249_vm0, %v233_v61 }
  0x4d   : > { %1718 = vmatprep.mubr.msk.f32.mxu0 %vm249_vm0, %v202_v62  ;;  %1766 = vmatprep.mubr.msk.f32.mxu1 %vm249_vm0, %v234_v63 }
  0x50   : > { %1719 = vmatmul.mubr.msk.f32.gmra.mrb[28].mxu0 %vm249_vm0, %v203_v0  ;;  %1767 = vmatmul.mubr.msk.f32.gmra.mrb[28].mxu1 %vm249_vm0, %v235_v1 }
  0x51   : > { %1721 = vmatprep.mubr.msk.f32.mxu0 %vm249_vm0, %v204_v2  ;;  %1769 = vmatprep.mubr.msk.f32.mxu1 %vm249_vm0, %v236_v3 }
  0x54   : > { %1722 = vmatmul.mubr.msk.f32.gmra.mrb[30].mxu0 %vm249_vm0, %v205_v4  ;;  %1770 = vmatmul.mubr.msk.f32.gmra.mrb[30].mxu1 %vm249_vm0, %v237_v5 }
  0xeb   : > { %v1678_v7 = vpop.f32.mrb[0].mxu0  ;;  %v1726_v8 = vpop.f32.mrb[0].mxu1 }
  0xec   : > { %v2240_v9 = vadd.f32 %v1678_v7, %v2237_v6  ;;  %v2243_v10 = vadd.f32 %v1726_v8, %v2237_v6  ;;  %v508_v11 = vpop.f32.mrb[1].mxu0  ;;  %v668_v12 = vpop.f32.mrb[1].mxu1 }
  0xed   : > { %v2248_v15 = vadd.f32 %v2237_v6, %v508_v11  ;;  %v2259_v22 = vadd.f32 %v2237_v6, %v668_v12 }
  0xee   : > { %893 = vmax.xlane.f32.xlu1 %v2243_v10  ;;  %829 = vmax.xlane.f32.xlu0 %v2240_v9 }
  0xef   : > { %v1681_v13 = vpop.f32.mrb[2].mxu0  ;;  %v1729_v14 = vpop.f32.mrb[2].mxu1 }
  0xf0   : > { %v2251_v16 = vadd.f32 %v1681_v13, %v2237_v6  ;;  %v518_v17 = vpop.f32.mrb[3].mxu0  ;;  %v678_v18 = vpop.f32.mrb[3].mxu1  ;;  %v2254_v19 = vadd.f32 %v1729_v14, %v2237_v6 }
  0xf1   : > { %v2264_v27 = vadd.f32 %v2237_v6, %v518_v17  ;;  %v2267_v28 = vadd.f32 %v2237_v6, %v678_v18 }
  0xf2   : > { %833 = vmax.xlane.f32.xlu1 %v2251_v16  ;;  %827 = vmax.xlane.f32.xlu0 %v2248_v15 }
  0xf3   : > { %v1684_v20 = vpop.f32.mrb[4].mxu0  ;;  %v1732_v21 = vpop.f32.mrb[4].mxu1 }
  0xf4   : > { %v528_v23 = vpop.f32.mrb[5].mxu0  ;;  %v688_v24 = vpop.f32.mrb[5].mxu1  ;;  %v2270_v31 = vadd.f32 %v1684_v20, %v2237_v6  ;;  %v2278_v37 = vadd.f32 %v1732_v21, %v2237_v6 }
  0xf5   : > { %v2275_v32 = vadd.f32 %v2237_v6, %v528_v23  ;;  %v2283_v38 = vadd.f32 %v2237_v6, %v688_v24 }
  0xf6   : > { %897 = vmax.xlane.f32.xlu1 %v2254_v19  ;;  %891 = vmax.xlane.f32.xlu0 %v2259_v22 }
  0xf7   : > { %v1687_v25 = vpop.f32.mrb[6].mxu0  ;;  %v1735_v26 = vpop.f32.mrb[6].mxu1 }
  0xf8   : > { %v538_v29 = vpop.f32.mrb[7].mxu0  ;;  %v698_v30 = vpop.f32.mrb[7].mxu1  ;;  %v2286_v43 = vadd.f32 %v1687_v25, %v2237_v6  ;;  %v2298_v49 = vadd.f32 %v1735_v26, %v2237_v6 }
  0xf9   : > { %v2291_v44 = vadd.f32 %v2237_v6, %v538_v29  ;;  %v2303_v50 = vadd.f32 %v2237_v6, %v698_v30 }
  0xfa   : > { %831 = vmax.xlane.f32.xlu1 %v2264_v27  ;;  %895 = vmax.xlane.f32.xlu0 %v2267_v28 }
  0xfb   : > { %v1690_v33 = vpop.f32.mrb[8].mxu0  ;;  %v1738_v34 = vpop.f32.mrb[8].mxu1 }
  0xfc   : > { %v548_v35 = vpop.f32.mrb[9].mxu0  ;;  %v708_v36 = vpop.f32.mrb[9].mxu1  ;;  %v2314_v55 = vadd.f32 %v1690_v33, %v2237_v6  ;;  %v2334_v1 = vadd.f32 %v1738_v34, %v2237_v6 }
  0xfd   : > { %v2319_v56 = vadd.f32 %v2237_v6, %v548_v35  ;;  %v2339_v2 = vadd.f32 %v2237_v6, %v708_v36 }
  0xfe   : > { %837 = vmax.xlane.f32.xlu1 %v2270_v31  ;;  %835 = vmax.xlane.f32.xlu0 %v2275_v32 }
  0xff   : > { %v1693_v39 = vpop.f32.mrb[10].mxu0  ;;  %v1741_v40 = vpop.f32.mrb[10].mxu1 }
 0x100   : > { %v558_v41 = vpop.f32.mrb[11].mxu0  ;;  %v718_v42 = vpop.f32.mrb[11].mxu1  ;;  %v2354_v14 = vadd.f32 %v1693_v39, %v2237_v6  ;;  %v2374_v30 = vadd.f32 %v1741_v40, %v2237_v6 }
 0x101   : > { %v2359_v17 = vadd.f32 %v2237_v6, %v558_v41  ;;  %v2379_v33 = vadd.f32 %v2237_v6, %v718_v42 }
 0x102   : > { %901 = vmax.xlane.f32.xlu1 %v2278_v37  ;;  %899 = vmax.xlane.f32.xlu0 %v2283_v38 }
 0x103   : > { %v1696_v45 = vpop.f32.mrb[12].mxu0  ;;  %v2293_v46 = vpop.f32.mrb[12].mxu1  ;;  %3000 = vst [vmem:[#allocation2_spill] sm:$0xff] %v2379_v33 }
 0x104   : > { %v568_v47 = vpop.f32.mrb[13].mxu0  ;;  %v2295_v48 = vpop.f32.mrb[13].mxu1 }
 0x105   : > { %v2399_v42 = vadd.f32 %v2237_v6, %v568_v47  ;;  %v2415_v47 = vadd.f32 %v2293_v46, %v2237_v6 }
 0x106   : > { %841 = vmax.xlane.f32.xlu1 %v2286_v43  ;;  %839 = vmax.xlane.f32.xlu0 %v2291_v44 }
 0x107   : > { %v2305_v51 = vpop.f32.mrb[14].mxu0  ;;  %v2307_v52 = vpop.f32.mrb[14].mxu1  ;;  %3002 = vst [vmem:[#allocation4_spill] sm:$0xff] %v2399_v42  ;;  %3003 = vst [vmem:[#allocation5_spill] sm:$0xff] %v2415_v47 }
 0x108   : > { %v2309_v53 = vpop.f32.mrb[15].mxu0  ;;  %v2311_v54 = vpop.f32.mrb[15].mxu1 }
 0x10a   : > { %905 = vmax.xlane.f32.xlu1 %v2298_v49  ;;  %903 = vmax.xlane.f32.xlu0 %v2303_v50 }
 0x10b   : > { %v1702_v57 = vpop.f32.mrb[16].mxu0  ;;  %v1750_v58 = vpop.f32.mrb[16].mxu1 }
 0x10c   : > { %v2322_v59 = vadd.f32 %v1702_v57, %v2237_v6  ;;  %v588_v60 = vpop.f32.mrb[17].mxu0  ;;  %v2325_v61 = vadd.f32 %v1750_v58, %v2237_v6  ;;  %v748_v62 = vpop.f32.mrb[17].mxu1 }
 0x10d   : > { %v2328_v63 = vadd.f32 %v2237_v6, %v588_v60  ;;  %v2331_v0 = vadd.f32 %v2237_v6, %v748_v62  ;;  %v2394_v60 = vadd.f32 %v1696_v45, %v2237_v6 }
 0x10e   : > { %845 = vmax.xlane.f32.xlu1 %v2314_v55  ;;  %843 = vmax.xlane.f32.xlu0 %v2319_v56 }
 0x10f   : > { %v1705_v3 = vpop.f32.mrb[18].mxu0  ;;  %v1753_v4 = vpop.f32.mrb[18].mxu1  ;;  %3001 = vst [vmem:[#allocation3_spill] sm:$0xff] %v2394_v60 }
 0x110   : > { %v2342_v5 = vadd.f32 %v1705_v3, %v2237_v6  ;;  %v598_v7 = vpop.f32.mrb[19].mxu0  ;;  %v2345_v8 = vadd.f32 %v1753_v4, %v2237_v6  ;;  %v758_v11 = vpop.f32.mrb[19].mxu1 }
 0x111   : > { %v2348_v12 = vadd.f32 %v2237_v6, %v598_v7  ;;  %v2351_v13 = vadd.f32 %v2237_v6, %v758_v11 }
 0x112   : > { %909 = vmax.xlane.f32.xlu1 %v2334_v1  ;;  %907 = vmax.xlane.f32.xlu0 %v2339_v2 }
 0x113   : > { %v1708_v18 = vpop.f32.mrb[20].mxu0  ;;  %v1756_v20 = vpop.f32.mrb[20].mxu1 }
 0x114   : > { %v2362_v21 = vadd.f32 %v1708_v18, %v2237_v6  ;;  %v608_v23 = vpop.f32.mrb[21].mxu0  ;;  %v2365_v24 = vadd.f32 %v1756_v20, %v2237_v6  ;;  %v768_v25 = vpop.f32.mrb[21].mxu1 }
 0x115   : > { %v2368_v26 = vadd.f32 %v2237_v6, %v608_v23  ;;  %v2371_v29 = vadd.f32 %v2237_v6, %v768_v25  ;;  %v2421_v23 = vadd.f32 %v2237_v6, %v2295_v48  ;;  %v2437_v48 = vadd.f32 %v2305_v51, %v2237_v6 }
 0x116   : > { %849 = vmax.xlane.f32.xlu1 %v2354_v14  ;;  %847 = vmax.xlane.f32.xlu0 %v2359_v17 }
 0x117   : > { %v1711_v34 = vpop.f32.mrb[22].mxu0  ;;  %v1759_v35 = vpop.f32.mrb[22].mxu1  ;;  %3004 = vst [vmem:[#allocation6_spill] sm:$0xff] %v2421_v23  ;;  %3006 = vst [vmem:[#allocation8_spill] sm:$0xff] %v2437_v48 }
 0x118   : > { %v2382_v36 = vadd.f32 %v1711_v34, %v2237_v6  ;;  %v618_v39 = vpop.f32.mrb[23].mxu0  ;;  %v2385_v41 = vadd.f32 %v1759_v35, %v2237_v6  ;;  %v778_v57 = vpop.f32.mrb[23].mxu1 }
 0x119   : > { %v2388_v40 = vadd.f32 %v2237_v6, %v618_v39  ;;  %v2391_v58 = vadd.f32 %v2237_v6, %v778_v57 }
 0x11a   : > { %913 = vmax.xlane.f32.xlu1 %v2374_v30  ;;  %911 = vmax.xlane.f32.xlu0 %v2379_v33 }
 0x11b   : > { %v1714_v62 = vpop.f32.mrb[24].mxu0  ;;  %v1762_v3 = vpop.f32.mrb[24].mxu1 }
 0x11c   : > { %v2402_v4 = vadd.f32 %v1714_v62, %v2237_v6  ;;  %v628_v7 = vpop.f32.mrb[25].mxu0  ;;  %v2405_v11 = vadd.f32 %v1762_v3, %v2237_v6  ;;  %v788_v18 = vpop.f32.mrb[25].mxu1 }
 0x11d   : > { %v2408_v45 = vadd.f32 %v2237_v6, %v628_v7  ;;  %v2411_v20 = vadd.f32 %v2237_v6, %v788_v18  ;;  %v2443_v7 = vadd.f32 %v2237_v6, %v2309_v53  ;;  %v2459_v53 = vadd.f32 %v2307_v52, %v2237_v6 }
 0x11e   : > { %853 = vmax.xlane.f32.xlu1 %v2394_v60  ;;  %851 = vmax.xlane.f32.xlu0 %v2399_v42 }
 0x11f   : > { %v1717_v25 = vpop.f32.mrb[26].mxu0  ;;  %v1765_v34 = vpop.f32.mrb[26].mxu1 }
 0x120   : > { %v2424_v35 = vadd.f32 %v1717_v25, %v2237_v6  ;;  %v638_v39 = vpop.f32.mrb[27].mxu0  ;;  %v2427_v57 = vadd.f32 %v1765_v34, %v2237_v6  ;;  %v798_v62 = vpop.f32.mrb[27].mxu1 }
 0x121   : > { %v2430_v46 = vadd.f32 %v2237_v6, %v638_v39  ;;  %v2433_v3 = vadd.f32 %v2237_v6, %v798_v62 }
 0x122   : > { %917 = vmax.xlane.f32.xlu1 %v2415_v47  ;;  %915 = vmax.xlane.f32.xlu0 %v2421_v23 }
 0x123   : > { %3005 = vst [vmem:[#allocation7_spill] sm:$0xff] %v2433_v3  ;;  %v1720_v18 = vpop.f32.mrb[28].mxu0  ;;  %v1768_v25 = vpop.f32.mrb[28].mxu1 }
 0x124   : > { %v2446_v34 = vadd.f32 %v1720_v18, %v2237_v6  ;;  %v648_v39 = vpop.f32.mrb[29].mxu0  ;;  %v2449_v62 = vadd.f32 %v1768_v25, %v2237_v6  ;;  %v808_v42 = vpop.f32.mrb[29].mxu1  ;;  %v2465_v18 = vadd.f32 %v2237_v6, %v2311_v54 }
 0x125   : > { %v2452_v51 = vadd.f32 %v2237_v6, %v648_v39  ;;  %v2455_v47 = vadd.f32 %v2237_v6, %v808_v42 }
 0x126   : > { %3007 = vst [vmem:[#allocation9_spill] sm:$0xff] %v2446_v34  ;;  %3008 = vst [vmem:[#allocation10_spill] sm:$0xff] %v2449_v62  ;;  %857 = vmax.xlane.f32.xlu1 %v2437_v48  ;;  %855 = vmax.xlane.f32.xlu0 %v2443_v7 }
 0x127   : > { %3009 = vst [vmem:[#allocation11_spill] sm:$0xff] %v2452_v51  ;;  %3010 = vst [vmem:[#allocation12_spill] sm:$0xff] %v2455_v47  ;;  %v1723_v25 = vpop.f32.mrb[30].mxu0  ;;  %v1771_v23 = vpop.f32.mrb[30].mxu1 }
 0x128   : > { %v2468_v39 = vadd.f32 %v1723_v25, %v2237_v6  ;;  %v658_v60 = vpop.f32.mrb[31].mxu0  ;;  %v2471_v42 = vadd.f32 %v1771_v23, %v2237_v6  ;;  %v818_v33 = vpop.f32.mrb[31].mxu1 }
 0x129   : > { %v2474_v52 = vadd.f32 %v2237_v6, %v658_v60  ;;  %v2477_v48 = vadd.f32 %v2237_v6, %v818_v33 }
 0x12a   : > { %3011 = vst [vmem:[#allocation13_spill] sm:$0xff] %v2468_v39  ;;  %3012 = vst [vmem:[#allocation14_spill] sm:$0xff] %v2471_v42  ;;  %921 = vmax.xlane.f32.xlu1 %v2459_v53  ;;  %919 = vmax.xlane.f32.xlu0 %v2465_v18 }
 0x12b   : > { %3013 = vst [vmem:[#allocation15_spill] sm:$0xff] %v2474_v52  ;;  %3014 = vst [vmem:[#allocation16_spill] sm:$0xff] %v2477_v48 }
 0x12e   : > { %861 = vmax.xlane.f32.xlu1 %v2322_v59  ;;  %859 = vmax.xlane.f32.xlu0 %v2328_v63 }
 0x132   : > { %925 = vmax.xlane.f32.xlu1 %v2325_v61  ;;  %923 = vmax.xlane.f32.xlu0 %v2331_v0 }
 0x136   : > { %865 = vmax.xlane.f32.xlu1 %v2342_v5  ;;  %863 = vmax.xlane.f32.xlu0 %v2348_v12 }
 0x13a   : > { %929 = vmax.xlane.f32.xlu1 %v2345_v8  ;;  %927 = vmax.xlane.f32.xlu0 %v2351_v13 }
 0x13e   : > { %869 = vmax.xlane.f32.xlu1 %v2362_v21  ;;  %867 = vmax.xlane.f32.xlu0 %v2368_v26 }
 0x142   : > { %933 = vmax.xlane.f32.xlu1 %v2365_v24  ;;  %931 = vmax.xlane.f32.xlu0 %v2371_v29 }
 0x146   : > { %873 = vmax.xlane.f32.xlu1 %v2382_v36  ;;  %871 = vmax.xlane.f32.xlu0 %v2388_v40 }
 0x14a   : > { %937 = vmax.xlane.f32.xlu1 %v2385_v41  ;;  %935 = vmax.xlane.f32.xlu0 %v2391_v58 }
 0x14e   : > { %877 = vmax.xlane.f32.xlu1 %v2402_v4  ;;  %875 = vmax.xlane.f32.xlu0 %v2408_v45 }
 0x152   : > { %941 = vmax.xlane.f32.xlu1 %v2405_v11  ;;  %939 = vmax.xlane.f32.xlu0 %v2411_v20 }
 0x156   : > { %881 = vmax.xlane.f32.xlu1 %v2424_v35  ;;  %879 = vmax.xlane.f32.xlu0 %v2430_v46 }
 0x15a   : > { %945 = vmax.xlane.f32.xlu1 %v2427_v57  ;;  %943 = vmax.xlane.f32.xlu0 %v2433_v3 }
 0x15e   : > { %885 = vmax.xlane.f32.xlu1 %v2446_v34  ;;  %883 = vmax.xlane.f32.xlu0 %v2452_v51 }
 0x162   : > { %949 = vmax.xlane.f32.xlu1 %v2449_v62  ;;  %947 = vmax.xlane.f32.xlu0 %v2455_v47 }
 0x166   : > { %889 = vmax.xlane.f32.xlu1 %v2468_v39  ;;  %887 = vmax.xlane.f32.xlu0 %v2474_v52 }
 0x16a   : > { %953 = vmax.xlane.f32.xlu1 %v2471_v42  ;;  %951 = vmax.xlane.f32.xlu0 %v2477_v48 }
 0x17b   : > { %v894_v6 = vpop.xlane.xlu1 %893  ;;  %v830_v54 = vpop.xlane.xlu0 %829 }
 0x17c   : > { %v988_v33 = vsub.f32 %v2243_v10, %v894_v6  ;;  %v956_v60 = vsub.f32 %v2240_v9, %v830_v54 }
 0x17e   : > { %v1021_v23 = vmul.f32 1.442695, %v956_v60  ;;  %v1085_v62 = vmul.f32 1.442695, %v988_v33 }
 0x17f   : > { %v834_v25 = vpop.xlane.xlu1 %833  ;;  %v828_v51 = vpop.xlane.xlu0 %827 }
 0x180   : > { %v958_v47 = vsub.f32 %v2251_v16, %v834_v25  ;;  %v955_v39 = vsub.f32 %v2248_v15, %v828_v51  ;;  %1792 = vpow2.f32 %v1021_v23 }
 0x181   : > { %1794 = vpow2.f32 %v1085_v62 }
 0x182   : > { %v1019_v52 = vmul.f32 1.442695, %v955_v39  ;;  %v1025_v48 = vmul.f32 1.442695, %v958_v47 }
 0x183   : > { %v898_v34 = vpop.xlane.xlu1 %897  ;;  %v892_v42 = vpop.xlane.xlu0 %891 }
 0x184   : > { %v987_v3 = vsub.f32 %v2259_v22, %v892_v42  ;;  %1796 = vpow2.f32 %v1019_v52  ;;  %v990_v10 = vsub.f32 %v2254_v19, %v898_v34 }
 0x185   : > { %1798 = vpow2.f32 %v1025_v48 }
 0x186   : > { %v1083_v9 = vmul.f32 1.442695, %v987_v3  ;;  %v1089_v16 = vmul.f32 1.442695, %v990_v10 }
 0x187   : > { %v832_v6 = vpop.xlane.xlu1 %831  ;;  %v896_v54 = vpop.xlane.xlu0 %895 }
 0x188   : > { %v957_v33 = vsub.f32 %v2264_v27, %v832_v6  ;;  %1800 = vpow2.f32 %v1083_v9  ;;  %v989_v15 = vsub.f32 %v2267_v28, %v896_v54 }
 0x18a   : > { %v1023_v51 = vmul.f32 1.442695, %v957_v33  ;;  %v2521_v39 = vpop.eup %1792  ;;  %v1087_v22 = vmul.f32 1.442695, %v989_v15 }
 0x18b   : > { %v838_v62 = vpop.xlane.xlu1 %837  ;;  %v836_v47 = vpop.xlane.xlu0 %835  ;;  %1149 = vadd.xlane.f32.xlu1 %v2521_v39 }
 0x18c   : > { %1802 = vpow2.f32 %v1023_v51  ;;  %v960_v19 = vsub.f32 %v2270_v31, %v838_v62  ;;  %v959_v3 = vsub.f32 %v2275_v32, %v836_v47  ;;  %v2526_v48 = vpop.eup %1794 }
 0x18d   : > { %1804 = vpow2.f32 %v1089_v16 }
 0x18e   : > { %v1029_v27 = vmul.f32 1.442695, %v960_v19  ;;  %v2528_v34 = vpop.eup %1796  ;;  %v1027_v31 = vmul.f32 1.442695, %v959_v3 }
 0x18f   : > { %v902_v28 = vpop.xlane.xlu1 %901  ;;  %v900_v42 = vpop.xlane.xlu0 %899  ;;  %1213 = vadd.xlane.f32.xlu1 %v2526_v48  ;;  %1147 = vadd.xlane.f32.xlu0 %v2528_v34 }
 0x190   : > { %1806 = vpow2.f32 %v1029_v27  ;;  %v992_v52 = vsub.f32 %v2278_v37, %v902_v28  ;;  %v991_v60 = vsub.f32 %v2283_v38, %v900_v42  ;;  %v2534_v23 = vpop.eup %1798 }
 0x191   : > { %1808 = vpow2.f32 %v1087_v22 }
 0x192   : > { %v1093_v32 = vmul.f32 1.442695, %v992_v52  ;;  %v2536_v25 = vpop.eup %1800  ;;  %v1091_v37 = vmul.f32 1.442695, %v991_v60 }
 0x193   : > { %v842_v10 = vpop.xlane.xlu1 %841  ;;  %v840_v9 = vpop.xlane.xlu0 %839  ;;  %1153 = vadd.xlane.f32.xlu1 %v2534_v23  ;;  %1211 = vadd.xlane.f32.xlu0 %v2536_v25 }
 0x194   : > { %1810 = vpow2.f32 %v1093_v32  ;;  %v962_v6 = vsub.f32 %v2286_v43, %v842_v10  ;;  %v961_v54 = vsub.f32 %v2291_v44, %v840_v9 }
 0x195   : > { %1812 = vpow2.f32 %v1027_v31 }
 0x196   : > { %v2542_v33 = vpop.eup %1802  ;;  %v1033_v38 = vmul.f32 1.442695, %v962_v6  ;;  %v1031_v43 = vmul.f32 1.442695, %v961_v54 }
 0x197   : > { %v2544_v16 = vpop.eup %1804  ;;  %v906_v15 = vpop.xlane.xlu1 %905  ;;  %1151 = vadd.xlane.f32.xlu0 %v2542_v33 }
 0x198   : > { %v904_v51 = vpop.xlane.xlu0 %903  ;;  %1814 = vpow2.f32 %v1033_v38  ;;  %1217 = vadd.xlane.f32.xlu1 %v2544_v16  ;;  %v994_v62 = vsub.f32 %v2298_v49, %v906_v15 }
 0x199   : > { %1816 = vpow2.f32 %v1091_v37  ;;  %v993_v47 = vsub.f32 %v2303_v50, %v904_v51 }
 0x19a   : > { %v2550_v19 = vpop.eup %1806  ;;  %v1097_v44 = vmul.f32 1.442695, %v994_v62 }
 0x19b   : > { %v2552_v22 = vpop.eup %1808  ;;  %v846_v3 = vpop.xlane.xlu1 %845  ;;  %v1095_v49 = vmul.f32 1.442695, %v993_v47 }
 0x19c   : > { %v844_v27 = vpop.xlane.xlu0 %843  ;;  %1818 = vpow2.f32 %v1097_v44  ;;  %1157 = vadd.xlane.f32.xlu1 %v2550_v19  ;;  %v964_v28 = vsub.f32 %v2314_v55, %v846_v3  ;;  %1215 = vadd.xlane.f32.xlu0 %v2552_v22 }
 0x19d   : > { %1820 = vpow2.f32 %v1031_v43  ;;  %v963_v42 = vsub.f32 %v2319_v56, %v844_v27  ;;  %v3015_v27 = vld [vmem:[#allocation2_spill] sm:$0xff] }
 0x19e   : > { %v2558_v52 = vpop.eup %1810  ;;  %v1037_v50 = vmul.f32 1.442695, %v964_v28 }
 0x19f   : > { %v2560_v31 = vpop.eup %1812  ;;  %v910_v60 = vpop.xlane.xlu1 %909  ;;  %v1035_v55 = vmul.f32 1.442695, %v963_v42 }
 0x1a0   : > { %v908_v32 = vpop.xlane.xlu0 %907  ;;  %1822 = vpow2.f32 %v1037_v50  ;;  %1221 = vadd.xlane.f32.xlu1 %v2558_v52  ;;  %v996_v10 = vsub.f32 %v2334_v1, %v910_v60  ;;  %1155 = vadd.xlane.f32.xlu0 %v2560_v31 }
 0x1a1   : > { %1824 = vpow2.f32 %v1095_v49  ;;  %v995_v9 = vsub.f32 %v2339_v2, %v908_v32  ;;  %v3016_v32 = vld [vmem:[#allocation3_spill] sm:$0xff] }
 0x1a2   : > { %v2566_v6 = vpop.eup %1814  ;;  %v1101_v56 = vmul.f32 1.442695, %v996_v10 }
 0x1a3   : > { %v2568_v37 = vpop.eup %1816  ;;  %v850_v54 = vpop.xlane.xlu1 %849  ;;  %v1099_v1 = vmul.f32 1.442695, %v995_v9 }
 0x1a4   : > { %v848_v38 = vpop.xlane.xlu0 %847  ;;  %1826 = vpow2.f32 %v1101_v56  ;;  %1161 = vadd.xlane.f32.xlu1 %v2566_v6  ;;  %v966_v15 = vsub.f32 %v2354_v14, %v850_v54  ;;  %1219 = vadd.xlane.f32.xlu0 %v2568_v37 }
 0x1a5   : > { %1828 = vpow2.f32 %v1035_v55  ;;  %v965_v51 = vsub.f32 %v2359_v17, %v848_v38  ;;  %v3017_v55 = vld [vmem:[#allocation4_spill] sm:$0xff] }
 0x1a6   : > { %v2574_v62 = vpop.eup %1818  ;;  %v1041_v2 = vmul.f32 1.442695, %v966_v15 }
 0x1a7   : > { %v2576_v43 = vpop.eup %1820  ;;  %v914_v47 = vpop.xlane.xlu1 %913  ;;  %v1039_v14 = vmul.f32 1.442695, %v965_v51  ;;  %v3018_v51 = vld [vmem:[#allocation5_spill] sm:$0xff] }
 0x1a8   : > { %v912_v44 = vpop.xlane.xlu0 %911  ;;  %1830 = vpow2.f32 %v1041_v2  ;;  %1225 = vadd.xlane.f32.xlu1 %v2574_v62  ;;  %v998_v3 = vsub.f32 %v2374_v30, %v914_v47  ;;  %1159 = vadd.xlane.f32.xlu0 %v2576_v43 }
 0x1a9   : > { %1832 = vpow2.f32 %v1099_v1  ;;  %v997_v28 = vsub.f32 %v3015_v27, %v912_v44  ;;  %v3019_v44 = vld [vmem:[#allocation6_spill] sm:$0xff] }
 0x1aa   : > { %v2582_v49 = vpop.eup %1822  ;;  %v1105_v17 = vmul.f32 1.442695, %v998_v3 }
 0x1ab   : > { %v2584_v42 = vpop.eup %1824  ;;  %v854_v50 = vpop.xlane.xlu1 %853  ;;  %v1103_v30 = vmul.f32 1.442695, %v997_v28 }
 0x1ac   : > { %v852_v60 = vpop.xlane.xlu0 %851  ;;  %1834 = vpow2.f32 %v1105_v17  ;;  %1165 = vadd.xlane.f32.xlu1 %v2582_v49  ;;  %v968_v10 = vsub.f32 %v3016_v32, %v854_v50  ;;  %1223 = vadd.xlane.f32.xlu0 %v2584_v42 }
 0x1ad   : > { %1836 = vpow2.f32 %v1039_v14  ;;  %v967_v9 = vsub.f32 %v3017_v55, %v852_v60  ;;  %v3020_v60 = vld [vmem:[#allocation8_spill] sm:$0xff] }
 0x1ae   : > { %v2590_v56 = vpop.eup %1826  ;;  %v1045_v54 = vmul.f32 1.442695, %v968_v10 }
 0x1af   : > { %v2592_v38 = vpop.eup %1828  ;;  %v918_v15 = vpop.xlane.xlu1 %917  ;;  %v1043_v47 = vmul.f32 1.442695, %v967_v9 }
 0x1b0   : > { %v916_v1 = vpop.xlane.xlu0 %915  ;;  %1838 = vpow2.f32 %v1045_v54  ;;  %1229 = vadd.xlane.f32.xlu1 %v2590_v56  ;;  %v1000_v2 = vsub.f32 %v3018_v51, %v918_v15  ;;  %1163 = vadd.xlane.f32.xlu0 %v2592_v38 }
 0x1b1   : > { %1840 = vpow2.f32 %v1103_v30  ;;  %v999_v3 = vsub.f32 %v3019_v44, %v916_v1 }
 0x1b2   : > { %v2598_v14 = vpop.eup %1830  ;;  %v1109_v27 = vmul.f32 1.442695, %v1000_v2 }
 0x1b3   : > { %v2600_v28 = vpop.eup %1832  ;;  %v858_v17 = vpop.xlane.xlu1 %857  ;;  %v1107_v10 = vmul.f32 1.442695, %v999_v3 }
 0x1b4   : > { %v856_v50 = vpop.xlane.xlu0 %855  ;;  %1842 = vpow2.f32 %v1109_v27  ;;  %1169 = vadd.xlane.f32.xlu1 %v2598_v14  ;;  %v970_v32 = vsub.f32 %v3020_v60, %v858_v17  ;;  %1227 = vadd.xlane.f32.xlu0 %v2600_v28 }
 0x1b5   : > { %1844 = vpow2.f32 %v1043_v47  ;;  %v969_v30 = vsub.f32 %v2443_v7, %v856_v50 }
 0x1b6   : > { %v2606_v55 = vpop.eup %1834  ;;  %v1049_v9 = vmul.f32 1.442695, %v970_v32 }
 0x1b7   : > { %v2608_v54 = vpop.eup %1836  ;;  %v922_v15 = vpop.xlane.xlu1 %921  ;;  %v1047_v2 = vmul.f32 1.442695, %v969_v30 }
 0x1b8   : > { %v920_v1 = vpop.xlane.xlu0 %919  ;;  %1846 = vpow2.f32 %v1049_v9  ;;  %1233 = vadd.xlane.f32.xlu1 %v2606_v55  ;;  %v1002_v51 = vsub.f32 %v2459_v53, %v922_v15  ;;  %1167 = vadd.xlane.f32.xlu0 %v2608_v54 }
 0x1b9   : > { %1848 = vpow2.f32 %v1107_v10  ;;  %v1001_v47 = vsub.f32 %v2465_v18, %v920_v1 }
 0x1ba   : > { %v2614_v44 = vpop.eup %1838  ;;  %v1113_v7 = vmul.f32 1.442695, %v1002_v51 }
 0x1bb   : > { %v2616_v3 = vpop.eup %1840  ;;  %v862_v27 = vpop.xlane.xlu1 %861  ;;  %v1111_v53 = vmul.f32 1.442695, %v1001_v47 }
 0x1bc   : > { %v860_v17 = vpop.xlane.xlu0 %859  ;;  %1850 = vpow2.f32 %v1113_v7  ;;  %1173 = vadd.xlane.f32.xlu1 %v2614_v44  ;;  %v972_v50 = vsub.f32 %v2322_v59, %v862_v27  ;;  %1231 = vadd.xlane.f32.xlu0 %v2616_v3 }
 0x1bd   : > { %1852 = vpow2.f32 %v1047_v2  ;;  %v971_v60 = vsub.f32 %v2328_v63, %v860_v17 }
 0x1be   : > { %v2622_v32 = vpop.eup %1842  ;;  %v1053_v18 = vmul.f32 1.442695, %v972_v50 }
 0x1bf   : > { %v2624_v10 = vpop.eup %1844  ;;  %v926_v30 = vpop.xlane.xlu1 %925  ;;  %v1051_v59 = vmul.f32 1.442695, %v971_v60 }
 0x1c0   : > { %v924_v9 = vpop.xlane.xlu0 %923  ;;  %1854 = vpow2.f32 %v1053_v18  ;;  %1237 = vadd.xlane.f32.xlu1 %v2622_v32  ;;  %v1004_v15 = vsub.f32 %v2325_v61, %v926_v30  ;;  %1171 = vadd.xlane.f32.xlu0 %v2624_v10 }
 0x1c1   : > { %1856 = vpow2.f32 %v1111_v53  ;;  %v1003_v1 = vsub.f32 %v2331_v0, %v924_v9 }
 0x1c2   : > { %v2630_v51 = vpop.eup %1846  ;;  %v1117_v63 = vmul.f32 1.442695, %v1004_v15 }
 0x1c3   : > { %v2632_v2 = vpop.eup %1848  ;;  %v866_v47 = vpop.xlane.xlu1 %865  ;;  %v1115_v61 = vmul.f32 1.442695, %v1003_v1 }
 0x1c4   : > { %v864_v7 = vpop.xlane.xlu0 %863  ;;  %1858 = vpow2.f32 %v1117_v63  ;;  %1177 = vadd.xlane.f32.xlu1 %v2630_v51  ;;  %v974_v27 = vsub.f32 %v2342_v5, %v866_v47  ;;  %1235 = vadd.xlane.f32.xlu0 %v2632_v2 }
 0x1c5   : > { %1860 = vpow2.f32 %v1051_v59  ;;  %v973_v17 = vsub.f32 %v2348_v12, %v864_v7 }
 0x1c6   : > { %v2638_v50 = vpop.eup %1850  ;;  %v1057_v0 = vmul.f32 1.442695, %v974_v27 }
 0x1c7   : > { %v2640_v53 = vpop.eup %1852  ;;  %v930_v60 = vpop.xlane.xlu1 %929  ;;  %v1055_v5 = vmul.f32 1.442695, %v973_v17 }
 0x1c8   : > { %v928_v18 = vpop.xlane.xlu0 %927  ;;  %1862 = vpow2.f32 %v1057_v0  ;;  %1241 = vadd.xlane.f32.xlu1 %v2638_v50  ;;  %v1006_v30 = vsub.f32 %v2345_v8, %v930_v60  ;;  %1175 = vadd.xlane.f32.xlu0 %v2640_v53 }
 0x1c9   : > { %1864 = vpow2.f32 %v1115_v61  ;;  %v1005_v9 = vsub.f32 %v2351_v13, %v928_v18 }
 0x1ca   : > { %v2646_v15 = vpop.eup %1854  ;;  %v1121_v12 = vmul.f32 1.442695, %v1006_v30 }
 0x1cb   : > { %v2648_v59 = vpop.eup %1856  ;;  %v870_v1 = vpop.xlane.xlu1 %869  ;;  %v1119_v8 = vmul.f32 1.442695, %v1005_v9 }
 0x1cc   : > { %v868_v63 = vpop.xlane.xlu0 %867  ;;  %1866 = vpow2.f32 %v1121_v12  ;;  %1181 = vadd.xlane.f32.xlu1 %v2646_v15  ;;  %v976_v47 = vsub.f32 %v2362_v21, %v870_v1  ;;  %1239 = vadd.xlane.f32.xlu0 %v2648_v59 }
 0x1cd   : > { %1868 = vpow2.f32 %v1055_v5  ;;  %v975_v7 = vsub.f32 %v2368_v26, %v868_v63 }
 0x1ce   : > { %v2654_v27 = vpop.eup %1858  ;;  %v1061_v13 = vmul.f32 1.442695, %v976_v47 }
 0x1cf   : > { %v2656_v61 = vpop.eup %1860  ;;  %v934_v17 = vpop.xlane.xlu1 %933  ;;  %v1059_v21 = vmul.f32 1.442695, %v975_v7 }
 0x1d0   : > { %v932_v0 = vpop.xlane.xlu0 %931  ;;  %1870 = vpow2.f32 %v1061_v13  ;;  %1245 = vadd.xlane.f32.xlu1 %v2654_v27  ;;  %v1008_v60 = vsub.f32 %v2365_v24, %v934_v17  ;;  %1179 = vadd.xlane.f32.xlu0 %v2656_v61 }
 0x1d1   : > { %1872 = vpow2.f32 %v1119_v8  ;;  %v1007_v18 = vsub.f32 %v2371_v29, %v932_v0 }
 0x1d2   : > { %v2662_v30 = vpop.eup %1862  ;;  %v1125_v26 = vmul.f32 1.442695, %v1008_v60 }
 0x1d3   : > { %v2664_v5 = vpop.eup %1864  ;;  %v874_v9 = vpop.xlane.xlu1 %873  ;;  %v1123_v24 = vmul.f32 1.442695, %v1007_v18 }
 0x1d4   : > { %v872_v12 = vpop.xlane.xlu0 %871  ;;  %1874 = vpow2.f32 %v1125_v26  ;;  %1185 = vadd.xlane.f32.xlu1 %v2662_v30  ;;  %v978_v1 = vsub.f32 %v2382_v36, %v874_v9  ;;  %1243 = vadd.xlane.f32.xlu0 %v2664_v5 }
 0x1d5   : > { %1876 = vpow2.f32 %v1059_v21  ;;  %v977_v63 = vsub.f32 %v2388_v40, %v872_v12 }
 0x1d6   : > { %v2670_v47 = vpop.eup %1866  ;;  %v1065_v29 = vmul.f32 1.442695, %v978_v1 }
 0x1d7   : > { %v2672_v8 = vpop.eup %1868  ;;  %v938_v7 = vpop.xlane.xlu1 %937  ;;  %v1063_v36 = vmul.f32 1.442695, %v977_v63 }
 0x1d8   : > { %v936_v13 = vpop.xlane.xlu0 %935  ;;  %1878 = vpow2.f32 %v1065_v29  ;;  %1249 = vadd.xlane.f32.xlu1 %v2670_v47  ;;  %v1010_v17 = vsub.f32 %v2385_v41, %v938_v7  ;;  %1183 = vadd.xlane.f32.xlu0 %v2672_v8 }
 0x1d9   : > { %1880 = vpow2.f32 %v1123_v24  ;;  %v1009_v0 = vsub.f32 %v2391_v58, %v936_v13 }
 0x1da   : > { %v2678_v60 = vpop.eup %1870  ;;  %v1129_v40 = vmul.f32 1.442695, %v1010_v17 }
 0x1db   : > { %v2680_v21 = vpop.eup %1872  ;;  %v878_v18 = vpop.xlane.xlu1 %877  ;;  %v1127_v41 = vmul.f32 1.442695, %v1009_v0 }
 0x1dc   : > { %v876_v26 = vpop.xlane.xlu0 %875  ;;  %1882 = vpow2.f32 %v1129_v40  ;;  %1189 = vadd.xlane.f32.xlu1 %v2678_v60  ;;  %v980_v9 = vsub.f32 %v2402_v4, %v878_v18  ;;  %1247 = vadd.xlane.f32.xlu0 %v2680_v21 }
 0x1dd   : > { %1884 = vpow2.f32 %v1063_v36  ;;  %v979_v12 = vsub.f32 %v2408_v45, %v876_v26 }
 0x1de   : > { %v2686_v1 = vpop.eup %1874  ;;  %v1069_v58 = vmul.f32 1.442695, %v980_v9 }
 0x1df   : > { %v2688_v24 = vpop.eup %1876  ;;  %v942_v63 = vpop.xlane.xlu1 %941  ;;  %v1067_v4 = vmul.f32 1.442695, %v979_v12 }
 0x1e0   : > { %v940_v29 = vpop.xlane.xlu0 %939  ;;  %1886 = vpow2.f32 %v1069_v58  ;;  %1253 = vadd.xlane.f32.xlu1 %v2686_v1  ;;  %v1012_v7 = vsub.f32 %v2405_v11, %v942_v63  ;;  %1187 = vadd.xlane.f32.xlu0 %v2688_v24 }
 0x1e1   : > { %1888 = vpow2.f32 %v1127_v41  ;;  %v1011_v13 = vsub.f32 %v2411_v20, %v940_v29  ;;  %v3021_v29 = vld [vmem:[#allocation7_spill] sm:$0xff] }
 0x1e2   : > { %v2694_v17 = vpop.eup %1878  ;;  %v1133_v45 = vmul.f32 1.442695, %v1012_v7 }
 0x1e3   : > { %v2696_v36 = vpop.eup %1880  ;;  %v882_v0 = vpop.xlane.xlu1 %881  ;;  %v1131_v11 = vmul.f32 1.442695, %v1011_v13 }
 0x1e4   : > { %v880_v40 = vpop.xlane.xlu0 %879  ;;  %1890 = vpow2.f32 %v1133_v45  ;;  %1193 = vadd.xlane.f32.xlu1 %v2694_v17  ;;  %v982_v18 = vsub.f32 %v2424_v35, %v882_v0  ;;  %1251 = vadd.xlane.f32.xlu0 %v2696_v36 }
 0x1e5   : > { %1892 = vpow2.f32 %v1067_v4  ;;  %v981_v26 = vsub.f32 %v2430_v46, %v880_v40  ;;  %v3024_v40 = vld [vmem:[#allocation9_spill] sm:$0xff] }
 0x1e6   : > { %v2702_v9 = vpop.eup %1882  ;;  %v1073_v20 = vmul.f32 1.442695, %v982_v18 }
 0x1e7   : > { %v2704_v41 = vpop.eup %1884  ;;  %v946_v12 = vpop.xlane.xlu1 %945  ;;  %v1071_v35 = vmul.f32 1.442695, %v981_v26 }
 0x1e8   : > { %v944_v58 = vpop.xlane.xlu0 %943  ;;  %1894 = vpow2.f32 %v1073_v20  ;;  %1257 = vadd.xlane.f32.xlu1 %v2702_v9  ;;  %v1014_v63 = vsub.f32 %v2427_v57, %v946_v12  ;;  %1191 = vadd.xlane.f32.xlu0 %v2704_v41 }
 0x1e9   : > { %1896 = vpow2.f32 %v1131_v11  ;;  %v1013_v7 = vsub.f32 %v3021_v29, %v944_v58  ;;  %v3025_v11 = vld [vmem:[#allocation11_spill] sm:$0xff] }
 0x1ea   : > { %v2710_v4 = vpop.eup %1886  ;;  %v1137_v46 = vmul.f32 1.442695, %v1014_v63 }
 0x1eb   : > { %3022 = vst [vmem:[#allocation2_spill] sm:$0xff] %v2710_v4  ;;  %v2712_v13 = vpop.eup %1888  ;;  %v886_v45 = vpop.xlane.xlu1 %885  ;;  %v1135_v57 = vmul.f32 1.442695, %v1013_v7 }
 0x1ec   : > { %3023 = vst [vmem:[#allocation3_spill] sm:$0xff] %v2712_v13  ;;  %v884_v0 = vpop.xlane.xlu0 %883  ;;  %1898 = vpow2.f32 %v1137_v46  ;;  %1197 = vadd.xlane.f32.xlu1 %v2710_v4  ;;  %v984_v18 = vsub.f32 %v3024_v40, %v886_v45  ;;  %1255 = vadd.xlane.f32.xlu0 %v2712_v13  ;;  %v3028_v46 = vld [vmem:[#allocation10_spill] sm:$0xff] }
 0x1ed   : > { %1900 = vpow2.f32 %v1071_v35  ;;  %v983_v26 = vsub.f32 %v3025_v11, %v884_v0  ;;  %v3029_v35 = vld [vmem:[#allocation12_spill] sm:$0xff] }
 0x1ee   : > { %v2718_v20 = vpop.eup %1890  ;;  %v1077_v12 = vmul.f32 1.442695, %v984_v18 }
 0x1ef   : > { %3026 = vst [vmem:[#allocation4_spill] sm:$0xff] %v2718_v20  ;;  %v2720_v58 = vpop.eup %1892  ;;  %v950_v63 = vpop.xlane.xlu1 %949  ;;  %v1075_v45 = vmul.f32 1.442695, %v983_v26 }
 0x1f0   : > { %3027 = vst [vmem:[#allocation5_spill] sm:$0xff] %v2720_v58  ;;  %v948_v29 = vpop.xlane.xlu0 %947  ;;  %1902 = vpow2.f32 %v1077_v12  ;;  %1261 = vadd.xlane.f32.xlu1 %v2718_v20  ;;  %v1016_v4 = vsub.f32 %v3028_v46, %v950_v63  ;;  %1195 = vadd.xlane.f32.xlu0 %v2720_v58  ;;  %v3031_v12 = vld [vmem:[#allocation13_spill] sm:$0xff] }
 0x1f1   : > { %1904 = vpow2.f32 %v1135_v57  ;;  %v1015_v7 = vsub.f32 %v3029_v35, %v948_v29  ;;  %v3032_v57 = vld [vmem:[#allocation15_spill] sm:$0xff] }
 0x1f2   : > { %v2726_v40 = vpop.eup %1894  ;;  %v1141_v0 = vmul.f32 1.442695, %v1016_v4 }
 0x1f3   : > { %3030 = vst [vmem:[#allocation6_spill] sm:$0xff] %v2726_v40  ;;  %v2728_v11 = vpop.eup %1896  ;;  %v890_v18 = vpop.xlane.xlu1 %889  ;;  %v1139_v63 = vmul.f32 1.442695, %v1015_v7 }
 0x1f4   : > { %v888_v13 = vpop.xlane.xlu0 %887  ;;  %1906 = vpow2.f32 %v1141_v0  ;;  %1201 = vadd.xlane.f32.xlu1 %v2726_v40  ;;  %v986_v20 = vsub.f32 %v3031_v12, %v890_v18  ;;  %1259 = vadd.xlane.f32.xlu0 %v2728_v11  ;;  %v3033_v0 = vld [vmem:[#allocation14_spill] sm:$0xff] }
 0x1f5   : > { %1908 = vpow2.f32 %v1075_v45  ;;  %v985_v26 = vsub.f32 %v3032_v57, %v888_v13  ;;  %v3034_v45 = vld [vmem:[#allocation16_spill] sm:$0xff] }
 0x1f6   : > { %v2734_v46 = vpop.eup %1898  ;;  %v1081_v29 = vmul.f32 1.442695, %v986_v20 }
 0x1f7   : > { %v2736_v35 = vpop.eup %1900  ;;  %v954_v4 = vpop.xlane.xlu1 %953  ;;  %v1079_v18 = vmul.f32 1.442695, %v985_v26 }
 0x1f8   : > { %v952_v58 = vpop.xlane.xlu0 %951  ;;  %1910 = vpow2.f32 %v1081_v29  ;;  %1265 = vadd.xlane.f32.xlu1 %v2734_v46  ;;  %v1018_v40 = vsub.f32 %v3033_v0, %v954_v4  ;;  %1199 = vadd.xlane.f32.xlu0 %v2736_v35 }
 0x1f9   : > { %1912 = vpow2.f32 %v1139_v63  ;;  %v1017_v7 = vsub.f32 %v3034_v45, %v952_v58 }
 0x1fa   : > { %v2742_v12 = vpop.eup %1902  ;;  %v1145_v13 = vmul.f32 1.442695, %v1018_v40 }
 0x1fb   : > { %v2744_v57 = vpop.eup %1904  ;;  %v1143_v20 = vmul.f32 1.442695, %v1017_v7 }
 0x1fc   : > { %1914 = vpow2.f32 %v1145_v13  ;;  %1205 = vadd.xlane.f32.xlu1 %v2742_v12  ;;  %1263 = vadd.xlane.f32.xlu0 %v2744_v57 }
 0x1fd   : > { %1916 = vpow2.f32 %v1079_v18 }
 0x1fe   : > { %v2748_v29 = vpop.eup %1906  ;;  %1918 = vpow2.f32 %v1143_v20 }
 0x1ff   : > { %v2750_v4 = vpop.eup %1908 }
 0x200   : > { %1269 = vadd.xlane.f32.xlu1 %v2748_v29  ;;  %1203 = vadd.xlane.f32.xlu0 %v2750_v4 }
 0x202   : > { %v2754_v58 = vpop.eup %1910 }
 0x203   : > { %3035 = vst [vmem:[#allocation8_spill] sm:$0xff] %v2754_v58  ;;  %v2756_v40 = vpop.eup %1912 }
 0x204   : > { %3036 = vst [vmem:[#allocation7_spill] sm:$0xff] %v2756_v40  ;;  %1209 = vadd.xlane.f32.xlu1 %v2754_v58  ;;  %1267 = vadd.xlane.f32.xlu0 %v2756_v40 }
 0x206   : > { %v2760_v63 = vpop.eup %1914 }
 0x207   : > { %3037 = vst [vmem:[#allocation9_spill] sm:$0xff] %v2760_v63  ;;  %v2762_v26 = vpop.eup %1916 }
 0x208   : > { %3038 = vst [vmem:[#allocation11_spill] sm:$0xff] %v2762_v26  ;;  %1273 = vadd.xlane.f32.xlu1 %v2760_v63  ;;  %1207 = vadd.xlane.f32.xlu0 %v2762_v26  ;;  %v2766_v0 = vpop.eup %1918 }
 0x209   : > { %3039 = vst [vmem:[#allocation10_spill] sm:$0xff] %v2766_v0 }
 0x20c   : > { %1271 = vadd.xlane.f32.xlu0 %v2766_v0 }
 0x218   : > { %v1150_v18 = vpop.xlane.xlu1 %1149 }
 0x219   : > { %1920 = vrcp.f32 %v1150_v18 }
 0x21c   : > { %v1214_v45 = vpop.xlane.xlu1 %1213  ;;  %v1148_v7 = vpop.xlane.xlu0 %1147 }
 0x21d   : > { %1922 = vrcp.f32 %v1214_v45 }
 0x21e   : > { %1924 = vrcp.f32 %v1148_v7 }
 0x220   : > { %v1154_v13 = vpop.xlane.xlu1 %1153  ;;  %v1212_v20 = vpop.xlane.xlu0 %1211 }
 0x221   : > { %1926 = vrcp.f32 %v1154_v13 }
 0x222   : > { %1928 = vrcp.f32 %v1212_v20 }
 0x223   : > { %v1921_v40 = vpop.eup %1920 }
 0x224   : > { %v1340_v18 = vmul.f32 %v1921_v40, %v2521_v39  ;;  %v1152_v45 = vpop.xlane.xlu0 %1151 }
 0x225   : > { %v1218_v0 = vpop.xlane.xlu1 %1217 }
 0x226   : > { %1930 = vrcp.f32 %v1218_v0  ;;  %1405 = vst.msk [vmem:[%s2774_s4 + $0x8] sm:$0xff] %vm1403_vm1, %v1340_v18 }
 0x227   : > { %1932 = vrcp.f32 %v1152_v45  ;;  %v1923_v7 = vpop.eup %1922 }
 0x228   : > { %v1925_v13 = vpop.eup %1924  ;;  %v1372_v20 = vmul.f32 %v1923_v7, %v2526_v48 }
 0x229   : > { %v1158_v26 = vpop.xlane.xlu1 %1157  ;;  %v1216_v63 = vpop.xlane.xlu0 %1215  ;;  %v1339_v58 = vmul.f32 %v1925_v13, %v2528_v34 }
 0x22a   : > { %1934 = vrcp.f32 %v1158_v26  ;;  %1437 = vst.msk [vmem:[%s2774_s4 + $0x108] sm:$0xff] %vm1403_vm1, %v1372_v20 }
 0x22b   : > { %1936 = vrcp.f32 %v1216_v63  ;;  %v1927_v39 = vpop.eup %1926  ;;  %1404 = vst.msk [vmem:[%s2774_s4] sm:$0xff] %vm1403_vm1, %v1339_v58 }
 0x22c   : > { %v1929_v40 = vpop.eup %1928  ;;  %v1342_v0 = vmul.f32 %v1927_v39, %v2534_v23 }
 0x22d   : > { %v1222_v18 = vpop.xlane.xlu1 %1221  ;;  %v1156_v45 = vpop.xlane.xlu0 %1155  ;;  %v1371_v48 = vmul.f32 %v1929_v40, %v2536_v25 }
 0x22e   : > { %1938 = vrcp.f32 %v1222_v18  ;;  %1407 = vst.msk [vmem:[%s2774_s4 + $0x18] sm:$0xff] %vm1403_vm1, %v1342_v0 }
 0x22f   : > { %1940 = vrcp.f32 %v1156_v45  ;;  %1436 = vst.msk [vmem:[%s2774_s4 + $0x100] sm:$0xff] %vm1403_vm1, %v1371_v48 }
 0x230   : > { %v1931_v34 = vpop.eup %1930 }
 0x231   : > { %v1933_v63 = vpop.eup %1932  ;;  %v1374_v58 = vmul.f32 %v1931_v34, %v2544_v16  ;;  %v1162_v26 = vpop.xlane.xlu1 %1161 }
 0x232   : > { %v1220_v7 = vpop.xlane.xlu0 %1219  ;;  %v1341_v23 = vmul.f32 %v1933_v63, %v2542_v33  ;;  %1942 = vrcp.f32 %v1162_v26 }
 0x233   : > { %1439 = vst.msk [vmem:[%s2774_s4 + $0x118] sm:$0xff] %vm1403_vm1, %v1374_v58  ;;  %1944 = vrcp.f32 %v1220_v7 }
 0x234   : > { %v1935_v25 = vpop.eup %1934  ;;  %1406 = vst.msk [vmem:[%s2774_s4 + $0x10] sm:$0xff] %vm1403_vm1, %v1341_v23 }
 0x235   : > { %v1937_v13 = vpop.eup %1936  ;;  %v1344_v20 = vmul.f32 %v1935_v25, %v2550_v19  ;;  %v1226_v39 = vpop.xlane.xlu1 %1225 }
 0x236   : > { %v1160_v40 = vpop.xlane.xlu0 %1159  ;;  %v1373_v16 = vmul.f32 %v1937_v13, %v2552_v22  ;;  %1946 = vrcp.f32 %v1226_v39 }
 0x237   : > { %1409 = vst.msk [vmem:[%s2774_s4 + $0x28] sm:$0xff] %vm1403_vm1, %v1344_v20  ;;  %1948 = vrcp.f32 %v1160_v40 }
 0x238   : > { %v1939_v33 = vpop.eup %1938  ;;  %1438 = vst.msk [vmem:[%s2774_s4 + $0x110] sm:$0xff] %vm1403_vm1, %v1373_v16 }
 0x239   : > { %v1941_v0 = vpop.eup %1940  ;;  %v1376_v18 = vmul.f32 %v1939_v33, %v2558_v52  ;;  %v1166_v45 = vpop.xlane.xlu1 %1165 }
 0x23a   : > { %v1224_v48 = vpop.xlane.xlu0 %1223  ;;  %v1343_v19 = vmul.f32 %v1941_v0, %v2560_v31  ;;  %1950 = vrcp.f32 %v1166_v45 }
 0x23b   : > { %1441 = vst.msk [vmem:[%s2774_s4 + $0x128] sm:$0xff] %vm1403_vm1, %v1376_v18  ;;  %1952 = vrcp.f32 %v1224_v48 }
 0x23c   : > { %v1943_v22 = vpop.eup %1942  ;;  %1408 = vst.msk [vmem:[%s2774_s4 + $0x20] sm:$0xff] %vm1403_vm1, %v1343_v19 }
 0x23d   : > { %v1945_v34 = vpop.eup %1944  ;;  %v1346_v63 = vmul.f32 %v1943_v22, %v2566_v6  ;;  %v1230_v58 = vpop.xlane.xlu1 %1229 }
 0x23e   : > { %v1164_v26 = vpop.xlane.xlu0 %1163  ;;  %v1375_v52 = vmul.f32 %v1945_v34, %v2568_v37  ;;  %1954 = vrcp.f32 %v1230_v58 }
 0x23f   : > { %1411 = vst.msk [vmem:[%s2774_s4 + $0x38] sm:$0xff] %vm1403_vm1, %v1346_v63  ;;  %1956 = vrcp.f32 %v1164_v26 }
 0x240   : > { %v1947_v31 = vpop.eup %1946  ;;  %1440 = vst.msk [vmem:[%s2774_s4 + $0x120] sm:$0xff] %vm1403_vm1, %v1375_v52 }
 0x241   : > { %v1949_v7 = vpop.eup %1948  ;;  %v1378_v23 = vmul.f32 %v1947_v31, %v2574_v62  ;;  %v1170_v25 = vpop.xlane.xlu1 %1169 }
 0x242   : > { %v1228_v13 = vpop.xlane.xlu0 %1227  ;;  %v1345_v6 = vmul.f32 %v1949_v7, %v2576_v43  ;;  %1958 = vrcp.f32 %v1170_v25 }
 0x243   : > { %1443 = vst.msk [vmem:[%s2774_s4 + $0x138] sm:$0xff] %vm1403_vm1, %v1378_v23  ;;  %1960 = vrcp.f32 %v1228_v13 }
 0x244   : > { %v1951_v37 = vpop.eup %1950  ;;  %1410 = vst.msk [vmem:[%s2774_s4 + $0x30] sm:$0xff] %vm1403_vm1, %v1345_v6 }
 0x245   : > { %v1953_v20 = vpop.eup %1952  ;;  %v1348_v39 = vmul.f32 %v1951_v37, %v2582_v49  ;;  %v1234_v40 = vpop.xlane.xlu1 %1233 }
 0x246   : > { %v1168_v16 = vpop.xlane.xlu0 %1167  ;;  %v1377_v62 = vmul.f32 %v1953_v20, %v2584_v42  ;;  %1962 = vrcp.f32 %v1234_v40 }
 0x247   : > { %1413 = vst.msk [vmem:[%s2774_s4 + $0x48] sm:$0xff] %vm1403_vm1, %v1348_v39  ;;  %1964 = vrcp.f32 %v1168_v16 }
 0x248   : > { %v1955_v43 = vpop.eup %1954  ;;  %1442 = vst.msk [vmem:[%s2774_s4 + $0x130] sm:$0xff] %vm1403_vm1, %v1377_v62 }
 0x249   : > { %v1957_v33 = vpop.eup %1956  ;;  %v1380_v0 = vmul.f32 %v1955_v43, %v2590_v56  ;;  %v1174_v18 = vpop.xlane.xlu1 %1173 }
 0x24a   : > { %v1232_v45 = vpop.xlane.xlu0 %1231  ;;  %v1347_v49 = vmul.f32 %v1957_v33, %v2592_v38  ;;  %1966 = vrcp.f32 %v1174_v18 }
 0x24b   : > { %1445 = vst.msk [vmem:[%s2774_s4 + $0x148] sm:$0xff] %vm1403_vm1, %v1380_v0  ;;  %1968 = vrcp.f32 %v1232_v45 }
 0x24c   : > { %v1959_v42 = vpop.eup %1958  ;;  %1412 = vst.msk [vmem:[%s2774_s4 + $0x40] sm:$0xff] %vm1403_vm1, %v1347_v49 }
 0x24d   : > { %v1961_v48 = vpop.eup %1960  ;;  %v1350_v19 = vmul.f32 %v1959_v42, %v2598_v14  ;;  %v1238_v22 = vpop.xlane.xlu1 %1237 }
 0x24e   : > { %v1172_v34 = vpop.xlane.xlu0 %1171  ;;  %v1379_v56 = vmul.f32 %v1961_v48, %v2600_v28  ;;  %1970 = vrcp.f32 %v1238_v22 }
 0x24f   : > { %1415 = vst.msk [vmem:[%s2774_s4 + $0x58] sm:$0xff] %vm1403_vm1, %v1350_v19  ;;  %1972 = vrcp.f32 %v1172_v34 }
 0x250   : > { %v1963_v38 = vpop.eup %1962  ;;  %1444 = vst.msk [vmem:[%s2774_s4 + $0x140] sm:$0xff] %vm1403_vm1, %v1379_v56 }
 0x251   : > { %v1965_v63 = vpop.eup %1964  ;;  %v1382_v58 = vmul.f32 %v1963_v38, %v2606_v55  ;;  %v1178_v26 = vpop.xlane.xlu1 %1177 }
 0x252   : > { %v1236_v52 = vpop.xlane.xlu0 %1235  ;;  %v1349_v14 = vmul.f32 %v1965_v63, %v2608_v54  ;;  %1974 = vrcp.f32 %v1178_v26 }
 0x253   : > { %1447 = vst.msk [vmem:[%s2774_s4 + $0x158] sm:$0xff] %vm1403_vm1, %v1382_v58  ;;  %1976 = vrcp.f32 %v1236_v52 }
 0x254   : > { %v1967_v28 = vpop.eup %1966  ;;  %1414 = vst.msk [vmem:[%s2774_s4 + $0x50] sm:$0xff] %vm1403_vm1, %v1349_v14 }
 0x255   : > { %v1969_v31 = vpop.eup %1968  ;;  %v1352_v7 = vmul.f32 %v1967_v28, %v2614_v44  ;;  %v1242_v23 = vpop.xlane.xlu1 %1241 }
 0x256   : > { %v1176_v25 = vpop.xlane.xlu0 %1175  ;;  %v1381_v55 = vmul.f32 %v1969_v31, %v2616_v3  ;;  %1978 = vrcp.f32 %v1242_v23 }
 0x257   : > { %1417 = vst.msk [vmem:[%s2774_s4 + $0x68] sm:$0xff] %vm1403_vm1, %v1352_v7  ;;  %1980 = vrcp.f32 %v1176_v25 }
 0x258   : > { %v1971_v54 = vpop.eup %1970  ;;  %1446 = vst.msk [vmem:[%s2774_s4 + $0x150] sm:$0xff] %vm1403_vm1, %v1381_v55 }
 0x259   : > { %v1973_v13 = vpop.eup %1972  ;;  %v1384_v6 = vmul.f32 %v1971_v54, %v2622_v32  ;;  %v1182_v37 = vpop.xlane.xlu1 %1181 }
 0x25a   : > { %v1240_v20 = vpop.xlane.xlu0 %1239  ;;  %v1351_v44 = vmul.f32 %v1973_v13, %v2624_v10  ;;  %1982 = vrcp.f32 %v1182_v37 }
 0x25b   : > { %1449 = vst.msk [vmem:[%s2774_s4 + $0x168] sm:$0xff] %vm1403_vm1, %v1384_v6  ;;  %1984 = vrcp.f32 %v1240_v20 }
 0x25c   : > { %v1975_v3 = vpop.eup %1974  ;;  %1416 = vst.msk [vmem:[%s2774_s4 + $0x60] sm:$0xff] %vm1403_vm1, %v1351_v44 }
 0x25d   : > { %v1977_v39 = vpop.eup %1976  ;;  %v1354_v40 = vmul.f32 %v1975_v3, %v2630_v51  ;;  %v1246_v16 = vpop.xlane.xlu1 %1245 }
 0x25e   : > { %v1180_v62 = vpop.xlane.xlu0 %1179  ;;  %v1383_v32 = vmul.f32 %v1977_v39, %v2632_v2  ;;  %1986 = vrcp.f32 %v1246_v16 }
 0x25f   : > { %1419 = vst.msk [vmem:[%s2774_s4 + $0x78] sm:$0xff] %vm1403_vm1, %v1354_v40  ;;  %1988 = vrcp.f32 %v1180_v62 }
 0x260   : > { %v1979_v10 = vpop.eup %1978  ;;  %1448 = vst.msk [vmem:[%s2774_s4 + $0x160] sm:$0xff] %vm1403_vm1, %v1383_v32 }
 0x261   : > { %v1981_v43 = vpop.eup %1980  ;;  %v1386_v33 = vmul.f32 %v1979_v10, %v2638_v50  ;;  %v1186_v0 = vpop.xlane.xlu1 %1185 }
 0x262   : > { %v1244_v18 = vpop.xlane.xlu0 %1243  ;;  %v1353_v51 = vmul.f32 %v1981_v43, %v2640_v53  ;;  %1990 = vrcp.f32 %v1186_v0  ;;  %v3040_v43 = vld [vmem:[#allocation2_spill] sm:$0xff] }
 0x263   : > { %1451 = vst.msk [vmem:[%s2774_s4 + $0x178] sm:$0xff] %vm1403_vm1, %v1386_v33  ;;  %1992 = vrcp.f32 %v1244_v18 }
 0x264   : > { %v1983_v2 = vpop.eup %1982  ;;  %1418 = vst.msk [vmem:[%s2774_s4 + $0x70] sm:$0xff] %vm1403_vm1, %v1353_v51  ;;  %v3041_v51 = vld [vmem:[#allocation3_spill] sm:$0xff] }
 0x265   : > { %v1985_v45 = vpop.eup %1984  ;;  %v1356_v49 = vmul.f32 %v1983_v2, %v2646_v15  ;;  %v1250_v42 = vpop.xlane.xlu1 %1249 }
 0x266   : > { %v1184_v48 = vpop.xlane.xlu0 %1183  ;;  %v1385_v50 = vmul.f32 %v1985_v45, %v2648_v59  ;;  %1994 = vrcp.f32 %v1250_v42  ;;  %v3042_v45 = vld [vmem:[#allocation4_spill] sm:$0xff] }
 0x267   : > { %1421 = vst.msk [vmem:[%s2774_s4 + $0x88] sm:$0xff] %vm1403_vm1, %v1356_v49  ;;  %1996 = vrcp.f32 %v1184_v48 }
 0x268   : > { %v1987_v53 = vpop.eup %1986  ;;  %1450 = vst.msk [vmem:[%s2774_s4 + $0x170] sm:$0xff] %vm1403_vm1, %v1385_v50  ;;  %v3043_v50 = vld [vmem:[#allocation5_spill] sm:$0xff] }
 0x269   : > { %v1989_v19 = vpop.eup %1988  ;;  %v1388_v22 = vmul.f32 %v1987_v53, %v2654_v27  ;;  %v1190_v34 = vpop.xlane.xlu1 %1189 }
 0x26a   : > { %v1248_v56 = vpop.xlane.xlu0 %1247  ;;  %v1355_v15 = vmul.f32 %v1989_v19, %v2656_v61  ;;  %1998 = vrcp.f32 %v1190_v34  ;;  %v3044_v34 = vld [vmem:[#allocation6_spill] sm:$0xff] }
 0x26b   : > { %1453 = vst.msk [vmem:[%s2774_s4 + $0x188] sm:$0xff] %vm1403_vm1, %v1388_v22  ;;  %2000 = vrcp.f32 %v1248_v56 }
 0x26c   : > { %v1991_v59 = vpop.eup %1990  ;;  %1420 = vst.msk [vmem:[%s2774_s4 + $0x80] sm:$0xff] %vm1403_vm1, %v1355_v15 }
 0x26d   : > { %v1993_v38 = vpop.eup %1992  ;;  %v1358_v63 = vmul.f32 %v1991_v59, %v2662_v30  ;;  %v1254_v58 = vpop.xlane.xlu1 %1253 }
 0x26e   : > { %v1188_v26 = vpop.xlane.xlu0 %1187  ;;  %v1387_v27 = vmul.f32 %v1993_v38, %v2664_v5  ;;  %2002 = vrcp.f32 %v1254_v58 }
 0x26f   : > { %1423 = vst.msk [vmem:[%s2774_s4 + $0x98] sm:$0xff] %vm1403_vm1, %v1358_v63  ;;  %2004 = vrcp.f32 %v1188_v26 }
 0x270   : > { %v1995_v61 = vpop.eup %1994  ;;  %1452 = vst.msk [vmem:[%s2774_s4 + $0x180] sm:$0xff] %vm1403_vm1, %v1387_v27 }
 0x271   : > { %v1997_v52 = vpop.eup %1996  ;;  %v1390_v14 = vmul.f32 %v1995_v61, %v2670_v47  ;;  %v1194_v28 = vpop.xlane.xlu1 %1193 }
 0x272   : > { %v1252_v31 = vpop.xlane.xlu0 %1251  ;;  %v1357_v30 = vmul.f32 %v1997_v52, %v2672_v8  ;;  %2006 = vrcp.f32 %v1194_v28 }
 0x273   : > { %1455 = vst.msk [vmem:[%s2774_s4 + $0x198] sm:$0xff] %vm1403_vm1, %v1390_v14  ;;  %2008 = vrcp.f32 %v1252_v31 }
 0x274   : > { %v1999_v5 = vpop.eup %1998  ;;  %1422 = vst.msk [vmem:[%s2774_s4 + $0x90] sm:$0xff] %vm1403_vm1, %v1357_v30 }
 0x275   : > { %v2001_v7 = vpop.eup %2000  ;;  %v1360_v23 = vmul.f32 %v1999_v5, %v2678_v60  ;;  %v1258_v25 = vpop.xlane.xlu1 %1257 }
 0x276   : > { %v1192_v55 = vpop.xlane.xlu0 %1191  ;;  %v1389_v47 = vmul.f32 %v2001_v7, %v2680_v21  ;;  %2010 = vrcp.f32 %v1258_v25 }
 0x277   : > { %1425 = vst.msk [vmem:[%s2774_s4 + $0xa8] sm:$0xff] %vm1403_vm1, %v1360_v23  ;;  %2012 = vrcp.f32 %v1192_v55  ;;  %v3045_v55 = vld [vmem:[#allocation8_spill] sm:$0xff] }
 0x278   : > { %v2003_v8 = vpop.eup %2002  ;;  %1454 = vst.msk [vmem:[%s2774_s4 + $0x190] sm:$0xff] %vm1403_vm1, %v1389_v47 }
 0x279   : > { %v2005_v54 = vpop.eup %2004  ;;  %v1392_v13 = vmul.f32 %v2003_v8, %v2686_v1  ;;  %v1198_v6 = vpop.xlane.xlu1 %1197  ;;  %v3046_v8 = vld [vmem:[#allocation7_spill] sm:$0xff] }
 0x27a   : > { %v1256_v37 = vpop.xlane.xlu0 %1255  ;;  %v1359_v60 = vmul.f32 %v2005_v54, %v2688_v24  ;;  %2014 = vrcp.f32 %v1198_v6 }
 0x27b   : > { %1457 = vst.msk [vmem:[%s2774_s4 + $0x1a8] sm:$0xff] %vm1403_vm1, %v1392_v13  ;;  %2016 = vrcp.f32 %v1256_v37  ;;  %v3048_v37 = vld [vmem:[#allocation11_spill] sm:$0xff] }
 0x27c   : > { %v2007_v21 = vpop.eup %2006  ;;  %1424 = vst.msk [vmem:[%s2774_s4 + $0xa0] sm:$0xff] %vm1403_vm1, %v1359_v60 }
 0x27d   : > { %v2009_v20 = vpop.eup %2008  ;;  %v1362_v44 = vmul.f32 %v2007_v21, %v2694_v17  ;;  %v1262_v3 = vpop.xlane.xlu1 %1261 }
 0x27e   : > { %v1196_v39 = vpop.xlane.xlu0 %1195  ;;  %v1391_v1 = vmul.f32 %v2009_v20, %v2696_v36  ;;  %2018 = vrcp.f32 %v1262_v3  ;;  %v3049_v20 = vld [vmem:[#allocation10_spill] sm:$0xff] }
 0x27f   : > { %1427 = vst.msk [vmem:[%s2774_s4 + $0xb8] sm:$0xff] %vm1403_vm1, %v1362_v44  ;;  %2020 = vrcp.f32 %v1196_v39 }
 0x280   : > { %v2011_v24 = vpop.eup %2010  ;;  %1456 = vst.msk [vmem:[%s2774_s4 + $0x1a0] sm:$0xff] %vm1403_vm1, %v1391_v1 }
 0x281   : > { %v2013_v40 = vpop.eup %2012  ;;  %v1394_v16 = vmul.f32 %v2011_v24, %v2702_v9  ;;  %v1202_v62 = vpop.xlane.xlu1 %1201 }
 0x282   : > { %v1260_v32 = vpop.xlane.xlu0 %1259  ;;  %v1361_v17 = vmul.f32 %v2013_v40, %v2704_v41  ;;  %2022 = vrcp.f32 %v1202_v62 }
 0x283   : > { %1459 = vst.msk [vmem:[%s2774_s4 + $0x1b8] sm:$0xff] %vm1403_vm1, %v1394_v16  ;;  %2024 = vrcp.f32 %v1260_v32 }
 0x284   : > { %v2015_v36 = vpop.eup %2014  ;;  %1426 = vst.msk [vmem:[%s2774_s4 + $0xb0] sm:$0xff] %vm1403_vm1, %v1361_v17 }
 0x285   : > { %v2017_v10 = vpop.eup %2016  ;;  %v1364_v33 = vmul.f32 %v2015_v36, %v3040_v43  ;;  %v1266_v0 = vpop.xlane.xlu1 %1265 }
 0x286   : > { %v1200_v18 = vpop.xlane.xlu0 %1199  ;;  %v1393_v9 = vmul.f32 %v2017_v10, %v3041_v51  ;;  %2026 = vrcp.f32 %v1266_v0 }
 0x287   : > { %1429 = vst.msk [vmem:[%s2774_s4 + $0xc8] sm:$0xff] %vm1403_vm1, %v1364_v33  ;;  %2028 = vrcp.f32 %v1200_v18 }
 0x288   : > { %v2019_v41 = vpop.eup %2018  ;;  %1458 = vst.msk [vmem:[%s2774_s4 + $0x1b0] sm:$0xff] %vm1403_vm1, %v1393_v9 }
 0x289   : > { %v2021_v2 = vpop.eup %2020  ;;  %v1396_v49 = vmul.f32 %v2019_v41, %v3042_v45  ;;  %v1206_v42 = vpop.xlane.xlu1 %1205 }
 0x28a   : > { %v1264_v48 = vpop.xlane.xlu0 %1263  ;;  %v1363_v53 = vmul.f32 %v2021_v2, %v3043_v50  ;;  %2030 = vrcp.f32 %v1206_v42 }
 0x28b   : > { %1461 = vst.msk [vmem:[%s2774_s4 + $0x1c8] sm:$0xff] %vm1403_vm1, %v1396_v49  ;;  %2032 = vrcp.f32 %v1264_v48 }
 0x28c   : > { %v2023_v19 = vpop.eup %2022  ;;  %1428 = vst.msk [vmem:[%s2774_s4 + $0xc0] sm:$0xff] %vm1403_vm1, %v1363_v53 }
 0x28d   : > { %v2025_v22 = vpop.eup %2024  ;;  %v1366_v56 = vmul.f32 %v2023_v19, %v3044_v34  ;;  %v1270_v15 = vpop.xlane.xlu1 %1269 }
 0x28e   : > { %v1204_v59 = vpop.xlane.xlu0 %1203  ;;  %v1395_v38 = vmul.f32 %v2025_v22, %v2728_v11  ;;  %2034 = vrcp.f32 %v1270_v15 }
 0x28f   : > { %1431 = vst.msk [vmem:[%s2774_s4 + $0xd8] sm:$0xff] %vm1403_vm1, %v1366_v56  ;;  %2036 = vrcp.f32 %v1204_v59 }
 0x290   : > { %v2027_v63 = vpop.eup %2026  ;;  %1460 = vst.msk [vmem:[%s2774_s4 + $0x1c0] sm:$0xff] %vm1403_vm1, %v1395_v38 }
 0x291   : > { %v2029_v58 = vpop.eup %2028  ;;  %v1398_v26 = vmul.f32 %v2027_v63, %v2734_v46  ;;  %v1210_v27 = vpop.xlane.xlu1 %1209 }
 0x292   : > { %v1268_v61 = vpop.xlane.xlu0 %1267  ;;  %v1365_v52 = vmul.f32 %v2029_v58, %v2736_v35  ;;  %2038 = vrcp.f32 %v1210_v27 }
 0x293   : > { %1463 = vst.msk [vmem:[%s2774_s4 + $0x1d8] sm:$0xff] %vm1403_vm1, %v1398_v26  ;;  %2040 = vrcp.f32 %v1268_v61 }
 0x294   : > { %v2031_v11 = vpop.eup %2030  ;;  %1430 = vst.msk [vmem:[%s2774_s4 + $0xd0] sm:$0xff] %vm1403_vm1, %v1365_v52 }
 0x295   : > { %v2033_v14 = vpop.eup %2032  ;;  %v1368_v28 = vmul.f32 %v2031_v11, %v2742_v12  ;;  %v1274_v31 = vpop.xlane.xlu1 %1273 }
 0x296   : > { %v1208_v30 = vpop.xlane.xlu0 %1207  ;;  %v1397_v46 = vmul.f32 %v2033_v14, %v2744_v57  ;;  %2042 = vrcp.f32 %v1274_v31 }
 0x297   : > { %1433 = vst.msk [vmem:[%s2774_s4 + $0xe8] sm:$0xff] %vm1403_vm1, %v1368_v28  ;;  %2044 = vrcp.f32 %v1208_v30 }
 0x298   : > { %v2035_v35 = vpop.eup %2034  ;;  %1462 = vst.msk [vmem:[%s2774_s4 + $0x1d0] sm:$0xff] %vm1403_vm1, %v1397_v46 }
 0x299   : > { %v2037_v5 = vpop.eup %2036  ;;  %v1400_v7 = vmul.f32 %v2035_v35, %v2748_v29 }
 0x29a   : > { %v1272_v23 = vpop.xlane.xlu0 %1271  ;;  %v1367_v12 = vmul.f32 %v2037_v5, %v2750_v4  ;;  %v3047_v4 = vld [vmem:[#allocation9_spill] sm:$0xff] }
 0x29b   : > { %2046 = vrcp.f32 %v1272_v23  ;;  %1465 = vst.msk [vmem:[%s2774_s4 + $0x1e8] sm:$0xff] %vm1403_vm1, %v1400_v7 }
 0x29c   : > { %v2039_v57 = vpop.eup %2038  ;;  %1432 = vst.msk [vmem:[%s2774_s4 + $0xe0] sm:$0xff] %vm1403_vm1, %v1367_v12 }
 0x29d   : > { %v2041_v25 = vpop.eup %2040  ;;  %v1370_v47 = vmul.f32 %v2039_v57, %v3045_v55 }
 0x29e   : > { %v1399_v54 = vmul.f32 %v2041_v25, %v3046_v8 }
 0x29f   : > { %1435 = vst.msk [vmem:[%s2774_s4 + $0xf8] sm:$0xff] %vm1403_vm1, %v1370_v47 }
 0x2a0   : > { %v2043_v29 = vpop.eup %2042  ;;  %1464 = vst.msk [vmem:[%s2774_s4 + $0x1e0] sm:$0xff] %vm1403_vm1, %v1399_v54 }
 0x2a1   : > { %v2045_v13 = vpop.eup %2044  ;;  %v1402_v6 = vmul.f32 %v2043_v29, %v3047_v4 }
 0x2a2   : > { %v1369_v60 = vmul.f32 %v2045_v13, %v3048_v37 }
 0x2a3   : > { %1467 = vst.msk [vmem:[%s2774_s4 + $0x1f8] sm:$0xff] %vm1403_vm1, %v1402_v6 }
 0x2a4   : > { %1434 = vst.msk [vmem:[%s2774_s4 + $0xf0] sm:$0xff] %vm1403_vm1, %v1369_v60 }
 0x2a5   : > { %v2047_v21 = vpop.eup %2046 }
 0x2a6   : > { %v1401_v44 = vmul.f32 %v2047_v21, %v3049_v20 }
 0x2a8   : > { %1466 = vst.msk [vmem:[%s2774_s4 + $0x1f0] sm:$0xff] %vm1403_vm1, %v1401_v44 }
 0x2a9 PF: > { %s13_s12 = sadd.s32 1, %s2054_s12  }
 0x2aa   : > { %p10_p4 = scmp.ge.s32.totalorder %s13_s12, 4  }
 0x2ac   :  { %12 = sbr.rel (!%p10_p4) target bundleno = 1 (0x1), region = 62 }

</bundles_post_ra>
